<compile_context>
chip_gen: v5e
topology: v5e:2x2
jax: 0.10.0
libtpu: 0.0.40
codegen_flags: <defaults>
</compile_context>

<pallas_src>
import functools
import math

import jax
import jax.numpy as jnp
from jax.experimental import pallas as pl
from jax.experimental.pallas import tpu as pltpu


def _merge_adjacent_axes(shape, order):
    """Merge input axes that remain adjacent (and in order) under `order`.

    Returns (reduced_shape, reduced_order) such that
        transpose(x.reshape(reduced_shape), reduced_order).ravel()
        == transpose(x, order).ravel()
    """
    groups = [[order[0]]]
    for a in order[1:]:
        if a == groups[-1][-1] + 1:
            groups[-1].append(a)
        else:
            groups.append([a])
    # `groups` is in *output* order; sorting by first input axis gives the
    # reduced *input* axis order.
    in_order_groups = sorted(groups, key=lambda g: g[0])
    reduced_shape = tuple(
        math.prod(shape[a] for a in g) for g in in_order_groups
    )
    pos = {tuple(g): i for i, g in enumerate(in_order_groups)}
    reduced_order = tuple(pos[tuple(g)] for g in groups)
    return reduced_shape, reduced_order


def _permute_kernel(r_order, out2d, x_ref, o_ref):
    # One (batched) transpose on the XLU, then flatten the result so the store
    # to the output block is a dense, lane-aligned, unmasked slab.
    y = jnp.transpose(x_ref[...], r_order)
    o_ref[...] = y.reshape(out2d)


def pallas_permute(x, order):
    """Pallas TPU implementation of x.permute(order)."""
    order = tuple(int(a) for a in order)
    ndim = x.ndim
    assert sorted(order) == list(range(ndim)), f"bad permutation {order}"

    out_shape = tuple(x.shape[a] for a in order)

    if order == tuple(range(ndim)):
        # Identity permutation — nothing to move.
        return x

    # Reduce the permutation to the minimal-rank transpose (lane-dense views).
    r_shape, r_order = _merge_adjacent_axes(x.shape, order)
    red_out = tuple(r_shape[a] for a in r_order)
    # Lane-dense flattened output slab: (leading, everything_else).
    out2d = (red_out[0], math.prod(red_out[1:]))

    nbytes = math.prod(x.shape) * jnp.dtype(x.dtype).itemsize
    # Whole-array blocks are the right call for small activations (8 KiB here).
    # TODO(synk): for large inputs, tile the leading reduced axis with a real
    # grid and set vmem_limit_bytes explicitly (v7x has only 32 MiB scoped VMEM).
    assert nbytes <= 4 * 1024 * 1024, "tile the leading axis for large inputs"

    x_r = jnp.reshape(x, r_shape)  # contiguous reshape: layout plumbing only
    n_in = len(r_shape)

    kernel = functools.partial(_permute_kernel, r_order, out2d)

    out2d_arr = pl.pallas_call(
        kernel,
        out_shape=jax.ShapeDtypeStruct(out2d, x.dtype),
        grid=(1,),  # single invocation: no pipeline bubbles / per-step overhead
        in_specs=[pl.BlockSpec(r_shape, lambda i: (0,) * n_in)],
        out_specs=pl.BlockSpec(out2d, lambda i: (0, 0)),
        compiler_params=pltpu.CompilerParams(
            dimension_semantics=("arbitrary",),
        ),
    )(x_r)

    return jnp.reshape(out2d_arr, out_shape)


class Permute:
    """JAX/Pallas mirror of the PyTorch Permute module."""

    def __init__(self, order=None):
        self.order = order

    def __call__(self, x, order=None):
        if order is None:
            order = self.order
        return pallas_permute(x, order)


if __name__ == "__main__":
    key = jax.random.PRNGKey(0)
    # NCHW input, small shapes.
    x = jax.random.normal(key, (2, 4, 16, 16), dtype=jnp.float32)

    order = (0, 2, 3, 1)  # NCHW -> NHWC
    mod = Permute(order)

    out = jax.block_until_ready(mod(x))

    # Correctness check vs. plain JAX transpose (same semantics as torch.permute).
    ref = jnp.transpose(x, order)
    assert out.shape == ref.shape, (out.shape, ref.shape)
    assert out.dtype == ref.dtype, (out.dtype, ref.dtype)
    assert bool(jnp.array_equal(out, ref))

    print("KERNEL_OK")
</pallas_src>

<mosaic_0001>
module attributes {stable_mosaic.version = 11 : i64} {
  func.func @_permute_kernel(%arg0: i32, %arg1: memref<2x4x256xf32, #tpu.memory_space<vmem>>, %arg2: memref<2x1024xf32, #tpu.memory_space<vmem>>) attributes {dimension_semantics = [#tpu.dimension_semantics<arbitrary>], iteration_bounds = array<i64: 1>, scalar_prefetch = 0 : i64, scratch_operands = 0 : i64, tpu.core_type = #tpu.core_type<tc>, window_params = [{pipeline_mode = #tpu.pipeline_mode<synchronous>, transform_indices = @transform_0, window_bounds = array<i64: 2, 4, 256>}, {pipeline_mode = #tpu.pipeline_mode<synchronous>, transform_indices = @transform_1, window_bounds = array<i64: 2, 1024>}]} {
    %c0 = arith.constant 0 : index
    %c0_0 = arith.constant 0 : index
    %c0_1 = arith.constant 0 : index
    %0 = vector.load %arg1[%c0, %c0_0, %c0_1] : memref<2x4x256xf32, #tpu.memory_space<vmem>>, vector<2x4x256xf32>
    %1 = tpu.transpose %0, [0, 2, 1] : vector<2x4x256xf32> -> vector<2x256x4xf32>
    %2 = vector.shape_cast %1 : vector<2x256x4xf32> to vector<2x1024xf32>
    %c0_2 = arith.constant 0 : index
    %c0_3 = arith.constant 0 : index
    %3 = vector.load %arg2[%c0_2, %c0_3] : memref<2x1024xf32, #tpu.memory_space<vmem>>, vector<2x1024xf32>
    tpu.vector_store %arg2[%c0_2, %c0_3], %2 {strides = array<i32>} : memref<2x1024xf32, #tpu.memory_space<vmem>>, vector<2x1024xf32>,
    return
  }
  func.func @transform_0(%arg0: i32) -> (i32, i32, i32) {
    %c0_i32 = arith.constant 0 : i32
    %c0_i32_0 = arith.constant 0 : i32
    %c0_i32_1 = arith.constant 0 : i32
    %c0_i32_2 = arith.constant 0 : i32
    return %c0_i32, %c0_i32_0, %c0_i32_1 : i32, i32, i32
  }
  func.func @transform_1(%arg0: i32) -> (i32, i32) {
    %c0_i32 = arith.constant 0 : i32
    %c0_i32_0 = arith.constant 0 : i32
    %c0_i32_1 = arith.constant 0 : i32
    return %c0_i32, %c0_i32_0 : i32, i32
  }
}

</mosaic_0001>

<bundles_post_ra>
// kernel: tpu_custom_call.1
= control target key start
LH: loop header
LB: loop body
LE: loop exit
PB: predicated region body
PF: predicated region fallthrough
CT: control target
= control target key end

     0   :  { %6 = vsyncpa [#allocation3], 0  ;;  %s5369_s0 = inlined_call_operand.hbm [shape: f32[2,4,256], index: 0, kind: input, shape index: {}]   ;;  %s5370_s1 = inlined_call_operand.hbm [shape: f32[2,1024], index: 1, kind: output, shape index: {}]  }
   0x1   :  { %7 = vsyncpa [#allocation4], 0  ;;  %s12_s8 = sshll.u32 %s5369_s0, 4  ;;  %s3237_s9 = smov [#allocation2]   ;;  %s13_s8 = int_to_ptr.hbm [resolvable:$true] %s12_s8 }
   0x2   :  { %s14_s10 = sshll.u32 %s3237_s9, 4  ;;  %s3238_s11 = smov 128   ;;  %s15_s10 = int_to_ptr.vmem [resolvable:$true] %s14_s10 }
   0x3   :  { %s3239_s12 = smov 8  }
   0x4   :  { %20 = dma.hbm_to_vmem [thread:$0]  %s13_s8, 256, %s15_s10, [#allocation3], %s3238_s11, %s3238_s11, %s3239_s12  }
   0x5   :  { %3233 = dma.done.wait [#allocation3], 256  }
   0x6   :  { %3234 = vsyncadd [#allocation3], 4294967040  ;;  %v25_v0 = vld [vmem:[#allocation2] sm:$0xff]  ;;  %v26_v1 = vld [vmem:[#allocation2 + $0x8] sm:$0xff]  ;;  %v3240_v6 = vmov 1983009808  }
   0x7   :  { %29 = vst [vmem:[#allocation1] ss:$2 sm:$0xff] %v25_v0  ;;  %v172_v7 = vunpack.c.l.s4 %v3240_v6  ;;  %v3241_v9 = vmov 1934713408   ;;  %vm169_vm0 = vcmask 1047556   ;;  %s3242_s0 = smov 4  }
   0x8   :  { %33 = vst [vmem:[#allocation1 + $0x10] ss:$2 sm:$0xff] %v26_v1  ;;  %v194_v10 = vunpack.c.l.s4 %v3241_v9  ;;  %s3243_s13 = smov 12   ;;  %s3244_s14 = smov 16   ;;  %vm5436_vm1 = vcmask 31744   ;;  %vm5435_vm2 = vcmask 64512  }
   0x9   :  { %v3287_v8 = vunpack.c.0.s8 %v172_v7  ;;  %s3245_s15 = smov 24   ;;  %s3246_s16 = smov 20   ;;  %vm2829_vm3 = vcmask 97280   ;;  %vm2831_vm4 = vcmask 130048   ;;  %vm2833_vm5 = vcmask 162816  }
   0xa   :  { %v3291_v15 = vunpack.c.0.s8 %v194_v10  ;;  %s3247_s17 = smov 28   ;;  %s3248_s18 = smov 32   ;;  %vm5415_vm6 = vcmask 195584   ;;  %vm5414_vm7 = vcmask 228352   ;;  %vm2839_vm8 = vcmask 261120  }
   0xb   :  { %s3249_s19 = smov 40   ;;  %s3250_s20 = smov 36   ;;  %vm2841_vm9 = vcmask 293888   ;;  %vm2843_vm10 = vcmask 326656   ;;  %vm5416_vm11 = vcmask 359424   ;;  %vm5417_vm12 = vcmask 392192  }
   0xc   :  { %s3251_s21 = smov 44   ;;  %s3252_s22 = smov 48   ;;  %vm5418_vm13 = vcmask 424960   ;;  %vm5419_vm14 = vcmask 457728   ;;  %vm5420_vm15 = vcmask 490496  }
   0xd   :  { %s3253_s23 = smov 52   ;;  %s3254_s24 = smov 56  }
   0xe   :  { %v30_v2 = vld.sshfl [vmem:[#allocation1] sm:$0xff pattern:$0x75316420]  ;;  %v31_v4 = vld.sshfl [vmem:[#allocation1 + $0x8] sm:$0xff pattern:$0x75316420] }
   0xf   :  { %v34_v3 = vld.sshfl [vmem:[#allocation1 + $0x10] sm:$0xff pattern:$0x75316420]  ;;  %40 = vxpose.xlu0.b32.start.end [1/1] (short) %v30_v2, 128  ;;  %v35_v5 = vld.sshfl [vmem:[#allocation1 + $0x18] sm:$0xff pattern:$0x75316420] }
  0x10   :  { %104 = vxpose.xlu1.b32.start.end [1/1] (short) %v34_v3, 128  ;;  %s3255_s25 = smov 60   ;;  %s3256_s26 = smov 64  }
  0x11   :  { %s3257_s27 = smov 68   ;;  %s5405_s28 = smov 80  }
  0x12   :  { %s3259_s29 = smov 84   ;;  %s3260_s30 = smov 88  }
  0x13   :  { %s3261_s2 = smov 92   ;;  %s3262_s3 = smov 76  }
  0x14   :  { %s3263_s4 = smov 96   ;;  %s5390_s5 = smov 100  }
  0x15   :  { %s3265_s6 = smov 72   ;;  %s3266_s7 = smov 104  }
  0x16   :  { %s3267_s8 = smov 108   ;;  %s3268_s9 = smov 112  }
  0x17   :  { %s3269_s10 = smov 116   ;;  %s5373_s11 = smov 120  }
  0x8f   :  { %72 = vxpose.xlu0.b32.start.end [1/1] (short) %v31_v4, 128 }
  0x90   :  { %136 = vxpose.xlu1.b32.start.end [1/1] (short) %v35_v5, 128 }
  0xb3   :  { %v56_v11 = vpop.trf.xlu0 }
  0xb4   :  { %v120_v12 = vpop.trf.xlu1  ;;  %v174_v13 = vperm.slane %v56_v11, %v3287_v8  ;;  %v168_v28 = vrot.slane %v56_v11, 4 }
  0xb5   :  { %v184_v14 = vperm.slane %v120_v12, %v3287_v8  ;;  %v179_v24 = vrot.slane %v120_v12, 4 }
  0xb6   :  { %v191_v16 = vrot.slane %v174_v13, 4  ;;  %v170_v31 = vsel %vm169_vm0, 0.0, %v168_v28 }
  0xb7   :  { %v189_v17 = vrot.slane %v184_v14, 4  ;;  %v180_v26 = vsel %vm169_vm0, 0.0, %v179_v24  ;;  %v178_v35 = vperm.slane %v170_v31, %v3287_v8 }
  0xb8   :  { %v192_v18 = vsel %vm169_vm0, %v184_v14, %v191_v16  ;;  %v188_v29 = vperm.slane %v180_v26, %v3287_v8 }
  0xb9   :  { %v200_v19 = vperm.slane %v192_v18, %v3291_v15  ;;  %v190_v20 = vsel %vm169_vm0, %v189_v17, %v174_v13  ;;  %v203_v39 = vrot.slane %v178_v35, 4 }
  0xba   :  { %v3297_v21 = vperm.slane %v190_v20, %v3291_v15  ;;  %v201_v32 = vrot.slane %v188_v29, 4 }
  0xbb   :  { %1838 = vrot.lane.b32.xlu2 %v200_v19, %s3239_s12  ;;  %v215_v30 = vrot.slane %v200_v19, 4  ;;  %v57_v34 = vpop.trf.xlu0  ;;  %v204_v42 = vsel %vm169_vm0, %v188_v29, %v203_v39 }
  0xbc   :  { %5439 = vst [vmem:[#allocation8_spill] sm:$0xff] %v3297_v21  ;;  %v3300_v22 = vpop.trf.xlu1  ;;  %v213_v23 = vrot.slane %v3297_v21, 4  ;;  %v202_v37 = vsel %vm169_vm0, %v201_v32, %v178_v35  ;;  %v212_v43 = vperm.slane %v204_v42, %v3291_v15  ;;  %v226_v53 = vperm.slane %v57_v34, %v3287_v8 }
  0xbd   :  { %v216_v33 = vsel %vm169_vm0, 0.0, %v215_v30  ;;  %v208_v38 = vperm.slane %v202_v37, %v3291_v15  ;;  %v236_v49 = vperm.slane %v3300_v22, %v3287_v8  ;;  %v231_v3 = vrot.slane %v3300_v22, 4 }
  0xbe   :  { %v214_v25 = vsel %vm169_vm0, 0.0, %v213_v23  ;;  %v219_v51 = vrot.slane %v212_v43, 4  ;;  %v243_v59 = vrot.slane %v226_v53, 4  ;;  %v221_v7 = vrot.slane %v57_v34, 4 }
  0xbf   :  { %v217_v46 = vrot.slane %v208_v38, 4  ;;  %v241_v52 = vrot.slane %v236_v49, 4  ;;  %v232_v5 = vsel %vm169_vm0, 0.0, %v231_v3 }
  0xc0   :  { %v220_v54 = vsel %vm169_vm0, 0.0, %v219_v51  ;;  %v244_v62 = vsel %vm169_vm0, %v236_v49, %v243_v59  ;;  %v240_v9 = vperm.slane %v232_v5, %v3287_v8  ;;  %v222_v12 = vsel %vm169_vm0, 0.0, %v221_v7 }
  0xc1   :  { %v218_v47 = vsel %vm169_vm0, 0.0, %v217_v46  ;;  %v242_v56 = vsel %vm169_vm0, %v241_v52, %v226_v53  ;;  %v252_v63 = vperm.slane %v244_v62, %v3291_v15  ;;  %v230_v16 = vperm.slane %v222_v12, %v3287_v8 }
  0xc2   :  { %v248_v58 = vperm.slane %v242_v56, %v3291_v15  ;;  %v253_v13 = vrot.slane %v240_v9, 4 }
  0xc3   :  { %1834 = vrot.lane.b32.xlu2 %v214_v25, %s3242_s0  ;;  %v3318_v40 = vpop.trf.xlu0  ;;  %v267_v10 = vrot.slane %v252_v63, 4  ;;  %v255_v26 = vrot.slane %v230_v16, 4 }
  0xc4   :  { %v3306_v27 = vpop.trf.xlu1  ;;  %v265_v1 = vrot.slane %v248_v58, 4  ;;  %v254_v18 = vsel %vm169_vm0, %v253_v13, %v230_v16  ;;  %v273_v59 = vrot.slane %v3318_v40, 4 }
  0xc5   :  { %v268_v14 = vsel %vm169_vm0, 0.0, %v267_v10  ;;  %v260_v20 = vperm.slane %v254_v18, %v3291_v15  ;;  %v256_v31 = vsel %vm169_vm0, %v240_v9, %v255_v26  ;;  %v288_v34 = vperm.slane %v3306_v27, %v3287_v8 }
  0xc6   :  { %v266_v4 = vsel %vm169_vm0, 0.0, %v265_v1  ;;  %v283_v53 = vrot.slane %v3306_v27, 4  ;;  %v274_v27 = vsel %vm169_vm0, 0.0, %v273_v59 }
  0xc7   :  { %v269_v24 = vrot.slane %v260_v20, 4  ;;  %v293_v42 = vrot.slane %v288_v34, 4  ;;  %v282_v7 = vperm.slane %v274_v27, %v3287_v8 }
  0xc8   :  { %v284_v56 = vsel %vm169_vm0, 0.0, %v283_v53 }
  0xc9   :  { %v270_v28 = vsel %vm169_vm0, 0.0, %v269_v24  ;;  %v307_v24 = vrot.slane %v282_v7, 4 }
  0xcb   :  { %1842 = vrot.lane.b32.xlu2 %v216_v33, %s3243_s13  ;;  %v3325_v44 = vpop.trf.xlu0  ;;  %v264_v33 = vperm.slane %v256_v31, %v3291_v15 }
  0xcc   :  { %v3313_v36 = vpop.trf.xlu1 }
  0xd3   :  { %1846 = vrot.lane.b32.xlu2 %v208_v38, %s3244_s14  ;;  %v3331_v48 = vpop.trf.xlu0  ;;  %v271_v38 = vrot.slane %v264_v33, 4 }
  0xd4   :  { %v3320_v41 = vpop.trf.xlu1 }
  0xd5   :  { %v272_v46 = vsel %vm169_vm0, 0.0, %v271_v38 }
  0xdb   :  { %1854 = vrot.lane.b32.xlu2 %v212_v43, %s3245_s15  ;;  %v3340_v55 = vpop.trf.xlu0  ;;  %v278_v43 = vperm.slane %v3318_v40, %v3287_v8 }
  0xdc   :  { %v3327_v45 = vpop.trf.xlu1 }
  0xe3   :  { %1850 = vrot.lane.b32.xlu2 %v218_v47, %s3246_s16  ;;  %v3349_v61 = vpop.trf.xlu0  ;;  %v294_v47 = vsel %vm169_vm0, %v293_v42, %v278_v43  ;;  %v295_v42 = vrot.slane %v278_v43, 4 }
  0xe4   :  { %v3335_v50 = vpop.trf.xlu1 }
  0xe5   :  { %v496_v27 = vperm.slane %v3335_v50, %v3287_v8 }
  0xeb   :  { %1858 = vrot.lane.b32.xlu2 %v220_v54, %s3247_s17  ;;  %v3356_v2 = vpop.trf.xlu0  ;;  %v300_v54 = vperm.slane %v294_v47, %v3291_v15  ;;  %v340_v47 = vperm.slane %v3313_v36, %v3287_v8 }
  0xec   :  { %v3343_v57 = vpop.trf.xlu1 }
  0xed   :  { %v317_v1 = vrot.slane %v300_v54, 4  ;;  %v345_v59 = vrot.slane %v340_v47, 4 }
  0xef   :  { %v318_v5 = vsel %vm169_vm0, 0.0, %v317_v1  ;;  %v330_v1 = vperm.slane %v3325_v44, %v3287_v8 }
  0xf3   :  { %1862 = vrot.lane.b32.xlu2 %v248_v58, %s3248_s18  ;;  %v3365_v11 = vpop.trf.xlu0 }
  0xf4   :  { %v3347_v60 = vpop.trf.xlu1 }
  0xfb   :  { %1870 = vrot.lane.b32.xlu2 %v252_v63, %s3249_s19  ;;  %v3374_v19 = vpop.trf.xlu0  ;;  %v292_v63 = vperm.slane %v284_v56, %v3287_v8  ;;  %v296_v56 = vsel %vm169_vm0, %v288_v34, %v295_v42 }
  0xfc   :  { %v3354_v0 = vpop.trf.xlu1 }
  0xfd   :  { %v308_v31 = vsel %vm169_vm0, %v292_v63, %v307_v24 }
 0x103   :  { %1866 = vrot.lane.b32.xlu2 %v266_v4, %s3250_s20  ;;  %v3382_v25 = vpop.trf.xlu0  ;;  %v305_v4 = vrot.slane %v292_v63, 4  ;;  %v304_v63 = vperm.slane %v296_v56, %v3291_v15 }
 0x104   :  { %v3362_v6 = vpop.trf.xlu1 }
 0x105   :  { %v306_v40 = vsel %vm169_vm0, %v305_v4, %v282_v7 }
 0x106   :  { %v312_v13 = vperm.slane %v306_v40, %v3291_v15  ;;  %v319_v40 = vrot.slane %v304_v63, 4 }
 0x108   :  { %v321_v16 = vrot.slane %v312_v13, 4 }
 0x10a   :  { %v322_v26 = vsel %vm169_vm0, 0.0, %v321_v16  ;;  %v486_v16 = vperm.slane %v3349_v61, %v3287_v8 }
 0x10b   :  { %1874 = vrot.lane.b32.xlu2 %v268_v14, %s3251_s21  ;;  %v3391_v32 = vpop.trf.xlu0 }
 0x10c   :  { %v3371_v17 = vpop.trf.xlu1 }
 0x113   :  { %1878 = vrot.lane.b32.xlu2 %v260_v20, %s3252_s22  ;;  %v3401_v39 = vpop.trf.xlu0 }
 0x114   :  { %v3378_v22 = vpop.trf.xlu1 }
 0x115   :  { %v3380_v23 = vpop.permute.xlu2 %1838 }
 0x116   :  { %5440 = vst [vmem:[#allocation9_spill] sm:$0xff] %v3380_v23 }
 0x11b   :  { %1882 = vrot.lane.b32.xlu2 %v270_v28, %s3253_s23  ;;  %v3412_v52 = vpop.trf.xlu0 }
 0x11c   :  { %v3386_v29 = vpop.trf.xlu1 }
 0x11d   :  { %v3388_v30 = vpop.permute.xlu2 %1834 }
 0x11e   :  { %5441 = vst [vmem:[#allocation10_spill] sm:$0xff] %v3388_v30 }
 0x123   :  { %1886 = vrot.lane.b32.xlu2 %v264_v33, %s3254_s24  ;;  %v3424_v3 = vpop.trf.xlu0  ;;  %v316_v33 = vperm.slane %v308_v31, %v3291_v15  ;;  %v320_v31 = vsel %vm169_vm0, 0.0, %v319_v40 }
 0x124   :  { %v3397_v35 = vpop.trf.xlu1 }
 0x125   :  { %v3399_v37 = vpop.permute.xlu2 %1842 }
 0x126   :  { %5442 = vst [vmem:[#allocation11_spill] sm:$0xff] %v3399_v37 }
 0x12b   :  { %1890 = vrot.lane.b32.xlu2 %v272_v46, %s3255_s25  ;;  %v3435_v12 = vpop.trf.xlu0 }
 0x12c   :  { %v3408_v49 = vpop.trf.xlu1 }
 0x12d   :  { %v3410_v51 = vpop.permute.xlu2 %1846 }
 0x12e   :  { %5443 = vst [vmem:[#allocation12_spill] sm:$0xff] %v3410_v51 }
 0x133   :  { %1894 = vrot.lane.b32.xlu2 %v300_v54, %s3256_s26  ;;  %v3441_v18 = vpop.trf.xlu0  ;;  %v323_v54 = vrot.slane %v316_v33, 4 }
 0x134   :  { %v3418_v58 = vpop.trf.xlu1 }
 0x135   :  { %v3421_v62 = vpop.permute.xlu2 %1854  ;;  %v324_v43 = vsel %vm169_vm0, 0.0, %v323_v54  ;;  %v481_v54 = vrot.slane %v3349_v61, 4 }
 0x136   :  { %5444 = vst [vmem:[#allocation13_spill] sm:$0xff] %v3421_v62 }
 0x13b   :  { %1898 = vrot.lane.b32.xlu2 %v318_v5, %s3257_s27  ;;  %v3451_v38 = vpop.trf.xlu0  ;;  %v346_v5 = vsel %vm169_vm0, %v345_v59, %v330_v1 }
 0x13c   :  { %v3433_v10 = vpop.trf.xlu1  ;;  %v352_v24 = vperm.slane %v346_v5, %v3291_v15 }
 0x13d   :  { %v3430_v9 = vpop.permute.xlu2 %1850 }
 0x13e   :  { %5445 = vst [vmem:[#allocation14_spill] sm:$0xff] %v3430_v9 }
 0x143   :  { %1910 = vrot.lane.b32.xlu2 %v312_v13, %s5405_s28  ;;  %v3468_v4 = vpop.trf.xlu0  ;;  %v501_v13 = vrot.slane %v496_v27, 4 }
 0x144   :  { %v3443_v20 = vpop.trf.xlu1 }
 0x145   :  { %v3439_v14 = vpop.permute.xlu2 %1858 }
 0x146   :  { %5446 = vst [vmem:[#allocation15_spill] sm:$0xff] %v3439_v14 }
 0x14b   :  { %1914 = vrot.lane.b32.xlu2 %v322_v26, %s3259_s29  ;;  %v491_v26 = vrot.slane %v3335_v50, 4  ;;  %v3487_v59 = vpop.trf.xlu0 }
 0x14c   :  { %v3453_v46 = vpop.trf.xlu1 }
 0x14d   :  { %v3447_v28 = vpop.permute.xlu2 %1862  ;;  %v492_v42 = vsel %vm169_vm0, 0.0, %v491_v26 }
 0x14e   :  { %5447 = vst [vmem:[#allocation16_spill] sm:$0xff] %v3447_v28  ;;  %v500_v40 = vperm.slane %v492_v42, %v3287_v8  ;;  %v335_v42 = vrot.slane %v3313_v36, 4 }
 0x150   :  { %v513_v26 = vrot.slane %v500_v40, 4 }
 0x153   :  { %1918 = vrot.lane.b32.xlu2 %v316_v33, %s3260_s30  ;;  %v502_v33 = vsel %vm169_vm0, %v501_v13, %v486_v16  ;;  %v347_v13 = vrot.slane %v330_v1, 4 }
 0x154   :  { %v3471_v7 = vpop.trf.xlu1  ;;  %v3490_v50 = vperm.slane %v502_v33, %v3291_v15 }
 0x155   :  { %v3458_v53 = vpop.permute.xlu2 %1870  ;;  %v348_v1 = vsel %vm169_vm0, %v340_v47, %v347_v13  ;;  %v325_v47 = vrot.slane %v3325_v44, 4 }
 0x156   :  { %5448 = vst [vmem:[#allocation17_spill] sm:$0xff] %v3458_v53  ;;  %v482_v53 = vsel %vm169_vm0, 0.0, %v481_v54 }
 0x15b   :  { %1922 = vrot.lane.b32.xlu2 %v324_v43, %s3261_s2  ;;  %v369_v43 = vrot.slane %v352_v24, 4 }
 0x15c   :  { %v3492_v5 = vpop.trf.xlu1 }
 0x15d   :  { %v3473_v34 = vpop.permute.xlu2 %1866  ;;  %v370_v61 = vsel %vm169_vm0, 0.0, %v369_v43  ;;  %v3510_v43 = vpop.trf.xlu0 }
 0x15e   :  { %5449 = vst [vmem:[#allocation18_spill] sm:$0xff] %v3473_v34 }
 0x162   :  { %1906 = vrot.lane.b32.xlu1 %v320_v31, %s3262_s3  ;;  %v503_v31 = vrot.slane %v486_v16, 4 }
 0x163   :  { %1926 = vrot.lane.b32.xlu2 %v352_v24, %s3263_s4 }
 0x164   :  { %v504_v24 = vsel %vm169_vm0, %v496_v27, %v503_v31  ;;  %v336_v31 = vsel %vm169_vm0, 0.0, %v335_v42 }
 0x165   :  { %v3485_v56 = vpop.permute.xlu2 %1874  ;;  %v3505_v16 = vperm.slane %v504_v24, %v3291_v15  ;;  %v548_v24 = vperm.slane %v3343_v57, %v3287_v8 }
 0x166   :  { %5450 = vst [vmem:[#allocation19_spill] sm:$0xff] %v3485_v56  ;;  %v490_v56 = vperm.slane %v482_v53, %v3287_v8  ;;  %v3512_v53 = vpop.trf.xlu1 }
 0x168   :  { %v514_v54 = vsel %vm169_vm0, %v513_v26, %v490_v56  ;;  %v515_v34 = vrot.slane %v490_v56, 4  ;;  %v543_v56 = vrot.slane %v3343_v57, 4  ;;  %v3527_v26 = vperm.slane %v336_v31, %v3287_v8 }
 0x169   :  { %v520_v27 = vperm.slane %v514_v54, %v3291_v15 }
 0x16a   :  { %2018 = vrot.lane.b32.xlu1 %v3490_v50, %s3256_s26  ;;  %v516_v36 = vsel %vm169_vm0, %v500_v40, %v515_v34  ;;  %v326_v34 = vsel %vm169_vm0, 0.0, %v325_v47  ;;  %v544_v44 = vsel %vm169_vm0, 0.0, %v543_v56  ;;  %v533_v40 = vrot.slane %v3356_v2, 4 }
 0x16b   :  { %1930 = vrot.lane.b32.xlu2 %v370_v61, %s5390_s5  ;;  %v356_v61 = vperm.slane %v348_v1, %v3291_v15  ;;  %v529_v42 = vrot.slane %v520_v27, 4  ;;  %v3532_v54 = vperm.slane %v516_v36, %v3291_v15  ;;  %v357_v31 = vrot.slane %v3527_v26, 4 }
 0x16c   :  { %v552_v28 = vperm.slane %v544_v44, %v3287_v8  ;;  %v534_v14 = vsel %vm169_vm0, 0.0, %v533_v40 }
 0x16d   :  { %v3502_v33 = vpop.permute.xlu2 %1878  ;;  %v371_v1 = vrot.slane %v356_v61, 4  ;;  %v531_v56 = vrot.slane %v3532_v54, 4  ;;  %v542_v51 = vperm.slane %v534_v14, %v3287_v8 }
 0x16e   :  { %5451 = vst [vmem:[#allocation20_spill] sm:$0xff] %v3502_v33  ;;  %v553_v33 = vrot.slane %v548_v24, 4  ;;  %v3545_v36 = vpop.trf.xlu1  ;;  %v565_v9 = vrot.slane %v552_v28, 4 }
 0x16f   :  { %v372_v57 = vsel %vm169_vm0, 0.0, %v371_v1 }
 0x172   :  { %2026 = vrot.lane.b32.xlu1 %v3505_v16, %s3265_s6 }
 0x173   :  { %1934 = vrot.lane.b32.xlu2 %v356_v61, %s3266_s7  ;;  %v530_v61 = vsel %vm169_vm0, 0.0, %v529_v42  ;;  %v532_v42 = vsel %vm169_vm0, 0.0, %v531_v56 }
 0x175   :  { %v3523_v13 = vpop.permute.xlu2 %1882  ;;  %1902 = vrot.lane.b32.xlu0 %v304_v63, %s3265_s6  ;;  %v538_v63 = vperm.slane %v3356_v2, %v3287_v8  ;;  %v334_v2 = vperm.slane %v326_v34, %v3287_v8 }
 0x176   :  { %5452 = vst [vmem:[#allocation21_spill] sm:$0xff] %v3523_v13  ;;  %v3539_v13 = vpop.trf.xlu0  ;;  %v3572_v14 = vpop.trf.xlu1 }
 0x177   :  { %v555_v47 = vrot.slane %v538_v63, 4  ;;  %v554_v1 = vsel %vm169_vm0, %v553_v33, %v538_v63  ;;  %v566_v63 = vsel %vm169_vm0, %v565_v9, %v542_v51  ;;  %v567_v9 = vrot.slane %v542_v51, 4 }
 0x178   :  { %v3562_v44 = vperm.slane %v554_v1, %v3291_v15  ;;  %v3579_v56 = vperm.slane %v566_v63, %v3291_v15 }
 0x17a   :  { %2034 = vrot.lane.b32.xlu1 %v520_v27, %s5405_s28  ;;  %v358_v27 = vsel %vm169_vm0, %v357_v31, %v334_v2 }
 0x17b   :  { %1938 = vrot.lane.b32.xlu2 %v372_v57, %s3267_s8  ;;  %v556_v57 = vsel %vm169_vm0, %v548_v24, %v555_v47  ;;  %v364_v34 = vperm.slane %v358_v27, %v3291_v15  ;;  %v600_v24 = vperm.slane %v3347_v60, %v3287_v8  ;;  %v595_v27 = vrot.slane %v3347_v60, 4 }
 0x17c   :  { %v564_v40 = vperm.slane %v556_v57, %v3291_v15  ;;  %v359_v57 = vrot.slane %v334_v2, 4  ;;  %v585_v60 = vrot.slane %v3365_v11, 4 }
 0x17d   :  { %v3552_v62 = vpop.permute.xlu2 %1886  ;;  %2038 = vrot.lane.b32.xlu0 %v530_v61, %s3259_s29  ;;  %v373_v61 = vrot.slane %v364_v34, 4  ;;  %v605_v1 = vrot.slane %v600_v24, 4  ;;  %v596_v63 = vsel %vm169_vm0, 0.0, %v595_v27 }
 0x17e   :  { %5453 = vst [vmem:[#allocation22_spill] sm:$0xff] %v3552_v62  ;;  %v3567_v33 = vpop.trf.xlu0  ;;  %v579_v47 = vrot.slane %v564_v40, 4  ;;  %v360_v2 = vsel %vm169_vm0, %v3527_v26, %v359_v57 }
 0x180   :  { %v580_v62 = vsel %vm169_vm0, 0.0, %v579_v47 }
 0x182   :  { %2046 = vrot.lane.b32.xlu1 %v532_v42, %s3261_s2  ;;  %v590_v42 = vperm.slane %v3365_v11, %v3287_v8  ;;  %v604_v11 = vperm.slane %v596_v63, %v3287_v8 }
 0x183   :  { %1942 = vrot.lane.b32.xlu2 %v364_v34, %s3268_s9  ;;  %v581_v34 = vrot.slane %v3579_v56, 4 }
 0x184   :  { %v606_v37 = vsel %vm169_vm0, %v605_v1, %v590_v42  ;;  %v368_v1 = vperm.slane %v360_v2, %v3291_v15 }
 0x185   :  { %v3574_v31 = vpop.permute.xlu2 %1890  ;;  %2050 = vrot.lane.b32.xlu0 %v3562_v44, %s3263_s4  ;;  %v582_v47 = vsel %vm169_vm0, 0.0, %v581_v34  ;;  %v3607_v27 = vperm.slane %v606_v37, %v3291_v15  ;;  %v382_v34 = vperm.slane %v3331_v48, %v3287_v8 }
 0x186   :  { %5454 = vst [vmem:[#allocation23_spill] sm:$0xff] %v3574_v31  ;;  %v374_v31 = vsel %vm169_vm0, 0.0, %v373_v61  ;;  %v3595_v51 = vpop.trf.xlu0  ;;  %v392_v61 = vperm.slane %v3320_v41, %v3287_v8 }
 0x187   :  { %5457 = vst [vmem:[#allocation26_spill] sm:$0xff] %v3607_v27  ;;  %v629_v37 = vrot.slane %v3607_v27, 4 }
 0x188   :  { %v397_v57 = vrot.slane %v392_v61, 4 }
 0x189   :  { %v630_v2 = vsel %vm169_vm0, 0.0, %v629_v37  ;;  %v652_v37 = vperm.slane %v3354_v0, %v3287_v8 }
 0x18a   :  { %2058 = vrot.lane.b32.xlu1 %v564_v40, %s3266_s7  ;;  %v568_v40 = vsel %vm169_vm0, %v552_v28, %v567_v9  ;;  %v607_v28 = vrot.slane %v590_v42, 4  ;;  %v617_v9 = vrot.slane %v604_v11, 4  ;;  %v375_v42 = vrot.slane %v368_v1, 4 }
 0x18b   :  { %1946 = vrot.lane.b32.xlu2 %v374_v31, %s3269_s10  ;;  %v3600_v31 = vpop.trf.xlu1  ;;  %v3612_v26 = vperm.slane %v568_v40, %v3291_v15 }
 0x18c   :  { %5456 = vst [vmem:[#allocation25_spill] sm:$0xff] %v3600_v31 }
 0x18d   :  { %v3592_v23 = vpop.permute.xlu2 %1894  ;;  %2062 = vrot.lane.b32.xlu0 %v580_v62, %s3267_s8  ;;  %v586_v62 = vsel %vm169_vm0, 0.0, %v585_v60  ;;  %v608_v60 = vsel %vm169_vm0, %v600_v24, %v607_v28 }
 0x18e   :  { %5455 = vst [vmem:[#allocation24_spill] sm:$0xff] %v3592_v23  ;;  %v594_v23 = vperm.slane %v586_v62, %v3287_v8  ;;  %v3628_v62 = vpop.trf.xlu0  ;;  %v3633_v30 = vperm.slane %v608_v60, %v3291_v15 }
 0x190   :  { %v618_v40 = vsel %vm169_vm0, %v617_v9, %v594_v23  ;;  %v619_v27 = vrot.slane %v594_v23, 4  ;;  %v647_v23 = vrot.slane %v3354_v0, 4 }
 0x191   :  { %v624_v24 = vperm.slane %v618_v40, %v3291_v15 }
 0x192   :  { %2070 = vrot.lane.b32.xlu1 %v582_v47, %s3269_s10  ;;  %v398_v47 = vsel %vm169_vm0, %v397_v57, %v382_v34  ;;  %v620_v57 = vsel %vm169_vm0, %v604_v11, %v619_v27  ;;  %v648_v40 = vsel %vm169_vm0, 0.0, %v647_v23  ;;  %v637_v11 = vrot.slane %v3374_v19, 4 }
 0x193   :  { %1950 = vrot.lane.b32.xlu2 %v368_v1, %s5373_s11  ;;  %v3630_v21 = vpop.trf.xlu1  ;;  %v376_v1 = vsel %vm169_vm0, 0.0, %v375_v42  ;;  %v3639_v28 = vperm.slane %v398_v47, %v3291_v15  ;;  %v633_v60 = vrot.slane %v624_v24, 4  ;;  %v642_v27 = vperm.slane %v3374_v19, %v3287_v8 }
 0x194   :  { %5459 = vst [vmem:[#allocation28_spill] sm:$0xff] %v3630_v21  ;;  %v656_v21 = vperm.slane %v648_v40, %v3287_v8  ;;  %v638_v19 = vsel %vm169_vm0, 0.0, %v637_v11 }
 0x195   :  { %v3620_v63 = vpop.permute.xlu2 %1898  ;;  %2074 = vrot.lane.b32.xlu0 %v3612_v26, %s5373_s11  ;;  %5460 = vst [vmem:[#allocation29_spill] sm:$0xff] %v3639_v28  ;;  %s3271_s11 = smov 124   ;;  %v421_v42 = vrot.slane %v3639_v28, 4  ;;  %v646_v31 = vperm.slane %v638_v19, %v3287_v8 }
 0x196   :  { %5458 = vst [vmem:[#allocation27_spill] sm:$0xff] %v3620_v63  ;;  %v3658_v47 = vpop.trf.xlu0  ;;  %v634_v63 = vsel %vm169_vm0, 0.0, %v633_v60 }
 0x197   :  { %5462 = vst [vmem:[#allocation31_spill] sm:$0xff] %v3658_v47  ;;  %v422_v0 = vsel %vm169_vm0, 0.0, %v421_v42  ;;  %v387_v42 = vrot.slane %v3320_v41, 4 }
 0x19a   :  { %2082 = vrot.lane.b32.xlu1 %v630_v2, %s3242_s0  ;;  %v3652_v2 = vperm.slane %v620_v57, %v3291_v15  ;;  %v659_v57 = vrot.slane %v642_v27, 4 }
 0x19b   :  { %1954 = vrot.lane.b32.xlu2 %v376_v1, %s3271_s11  ;;  %v399_v1 = vrot.slane %v382_v34, 4  ;;  %v3663_v28 = vpop.trf.xlu1 }
 0x19c   :  { %5463 = vst [vmem:[#allocation32_spill] sm:$0xff] %v3663_v28  ;;  %v635_v23 = vrot.slane %v3652_v2, 4  ;;  %v669_v28 = vrot.slane %v656_v21, 4 }
 0x19d   :  { %v3644_v9 = vpop.permute.xlu2 %1910  ;;  %2086 = vrot.lane.b32.xlu0 %v3633_v30, %s3239_s12  ;;  %v400_v34 = vsel %vm169_vm0, %v392_v61, %v399_v1 }
 0x19e   :  { %5461 = vst [vmem:[#allocation30_spill] sm:$0xff] %v3644_v9  ;;  %v657_v9 = vrot.slane %v652_v37, 4  ;;  %v636_v60 = vsel %vm169_vm0, 0.0, %v635_v23  ;;  %v408_v40 = vperm.slane %v400_v34, %v3291_v15  ;;  %v3686_v41 = vpop.trf.xlu0  ;;  %v704_v34 = vperm.slane %v3362_v6, %v3287_v8 }
 0x19f   :  { %5465 = vst [vmem:[#allocation34_spill] sm:$0xff] %v3686_v41 }
 0x1a0   :  { %v423_v23 = vrot.slane %v408_v40, 4 }
 0x1a2   :  { %2094 = vrot.lane.b32.xlu1 %v624_v24, %s3244_s14  ;;  %v658_v24 = vsel %vm169_vm0, %v657_v9, %v642_v27  ;;  %v377_v27 = vrot.slane %v3331_v48, 4  ;;  %v424_v48 = vsel %vm169_vm0, 0.0, %v423_v23 }
 0x1a3   :  { %1958 = vrot.lane.b32.xlu2 %v422_v0, %s3242_s0  ;;  %v660_v0 = vsel %vm169_vm0, %v652_v37, %v659_v57  ;;  %v3680_v11 = vperm.slane %v658_v24, %v3291_v15  ;;  %v3688_v9 = vpop.trf.xlu1  ;;  %v670_v37 = vsel %vm169_vm0, %v669_v28, %v646_v31 }
 0x1a4   :  { %v668_v61 = vperm.slane %v660_v0, %v3291_v15  ;;  %5466 = vst [vmem:[#allocation35_spill] sm:$0xff] %v3688_v9  ;;  %v3700_v24 = vperm.slane %v670_v37, %v3291_v15  ;;  %v694_v37 = vperm.slane %v3382_v25, %v3287_v8 }
 0x1a5   :  { %v3669_v47 = vpop.permute.xlu2 %1914  ;;  %2098 = vrot.lane.b32.xlu0 %v634_v63, %s3246_s16  ;;  %v388_v63 = vsel %vm169_vm0, 0.0, %v387_v42  ;;  %v378_v42 = vsel %vm169_vm0, 0.0, %v377_v27 }
 0x1a6   :  { %5464 = vst [vmem:[#allocation33_spill] sm:$0xff] %v3669_v47  ;;  %v396_v57 = vperm.slane %v388_v63, %v3287_v8  ;;  %v683_v19 = vrot.slane %v668_v61, 4  ;;  %v386_v63 = vperm.slane %v378_v42, %v3287_v8  ;;  %v699_v42 = vrot.slane %v3362_v6, 4 }
 0x1a8   :  { %v409_v28 = vrot.slane %v396_v57, 4  ;;  %v684_v0 = vsel %vm169_vm0, 0.0, %v683_v19 }
 0x1aa   :  { %2106 = vrot.lane.b32.xlu1 %v636_v60, %s3247_s17  ;;  %v671_v60 = vrot.slane %v646_v31, 4  ;;  %v3714_v31 = vpop.trf.xlu0  ;;  %v410_v27 = vsel %vm169_vm0, %v409_v28, %v386_v63 }
 0x1ab   :  { %1962 = vrot.lane.b32.xlu2 %v408_v40, %s3239_s12  ;;  %v685_v40 = vrot.slane %v3700_v24, 4  ;;  %5469 = vst [vmem:[#allocation38_spill] sm:$0xff] %v3714_v31  ;;  %v416_v47 = vperm.slane %v410_v27, %v3291_v15  ;;  %v711_v31 = vrot.slane %v694_v37, 4 }
 0x1ac   :  { %v672_v23 = vsel %vm169_vm0, %v656_v21, %v671_v60  ;;  %v700_v21 = vsel %vm169_vm0, 0.0, %v699_v42  ;;  %v411_v42 = vrot.slane %v386_v63, 4 }
 0x1ad   :  { %v3692_v1 = vpop.permute.xlu2 %1918  ;;  %2110 = vrot.lane.b32.xlu0 %v3680_v11, %s3248_s18  ;;  %v686_v19 = vsel %vm169_vm0, 0.0, %v685_v40  ;;  %v708_v27 = vperm.slane %v700_v21, %v3287_v8 }
 0x1ae   :  { %5467 = vst [vmem:[#allocation36_spill] sm:$0xff] %v3692_v1  ;;  %v709_v1 = vrot.slane %v704_v34, 4  ;;  %v412_v63 = vsel %vm169_vm0, %v396_v57, %v411_v42 }
 0x1b2   :  { %2118 = vrot.lane.b32.xlu1 %v668_v61, %s3249_s19  ;;  %v3716_v61 = vpop.trf.xlu1 }
 0x1b3   :  { %1966 = vrot.lane.b32.xlu2 %v424_v48, %s3243_s13  ;;  %5470 = vst [vmem:[#allocation39_spill] sm:$0xff] %v3716_v61  ;;  %v710_v48 = vsel %vm169_vm0, %v709_v1, %v694_v37  ;;  %v425_v1 = vrot.slane %v416_v47, 4  ;;  %v3738_v37 = vpop.trf.xlu0 }
 0x1b4   :  { %v716_v28 = vperm.slane %v710_v48, %v3291_v15  ;;  %5472 = vst [vmem:[#allocation41_spill] sm:$0xff] %v3738_v37 }
 0x1b5   :  { %v3711_v9 = vpop.permute.xlu2 %1922  ;;  %2122 = vrot.lane.b32.xlu0 %v684_v0, %s3251_s21  ;;  %v689_v0 = vrot.slane %v3382_v25, 4  ;;  %v712_v25 = vsel %vm169_vm0, %v704_v34, %v711_v31  ;;  %v721_v34 = vrot.slane %v708_v27, 4 }
 0x1b6   :  { %5468 = vst [vmem:[#allocation37_spill] sm:$0xff] %v3711_v9  ;;  %v3725_v9 = vperm.slane %v672_v23, %v3291_v15  ;;  %v733_v40 = vrot.slane %v716_v28, 4  ;;  %v3745_v48 = vperm.slane %v712_v25, %v3291_v15 }
 0x1b7   :  { %v690_v6 = vsel %vm169_vm0, 0.0, %v689_v0  ;;  %v426_v0 = vsel %vm169_vm0, 0.0, %v425_v1 }
 0x1b8   :  { %v735_v21 = vrot.slane %v3745_v48, 4 }
 0x1ba   :  { %2130 = vrot.lane.b32.xlu1 %v686_v19, %s3253_s23  ;;  %v3741_v23 = vpop.trf.xlu1  ;;  %v698_v19 = vperm.slane %v690_v6, %v3287_v8  ;;  %v756_v6 = vperm.slane %v3371_v17, %v3287_v8  ;;  %v736_v1 = vsel %vm169_vm0, 0.0, %v735_v21 }
 0x1bb   :  { %1970 = vrot.lane.b32.xlu2 %v416_v47, %s3244_s14  ;;  %5473 = vst [vmem:[#allocation42_spill] sm:$0xff] %v3741_v23  ;;  %v734_v47 = vsel %vm169_vm0, 0.0, %v733_v40  ;;  %v420_v40 = vperm.slane %v412_v63, %v3291_v15  ;;  %v3761_v25 = vpop.trf.xlu0  ;;  %v751_v23 = vrot.slane %v3371_v17, 4  ;;  %v444_v17 = vperm.slane %v3327_v45, %v3287_v8 }
 0x1bc   :  { %v723_v31 = vrot.slane %v698_v19, 4  ;;  %5475 = vst [vmem:[#allocation44_spill] sm:$0xff] %v3761_v25  ;;  %v741_v63 = vrot.slane %v3391_v32, 4 }
 0x1bd   :  { %v3732_v60 = vpop.permute.xlu2 %1926  ;;  %2134 = vrot.lane.b32.xlu0 %v3725_v9, %s3254_s24 }
 0x1be   :  { %5471 = vst [vmem:[#allocation40_spill] sm:$0xff] %v3732_v60 }
 0x1c2   :  { %2142 = vrot.lane.b32.xlu1 %v716_v28, %s3256_s26  ;;  %v722_v28 = vsel %vm169_vm0, %v721_v34, %v698_v19  ;;  %v746_v19 = vperm.slane %v3391_v32, %v3287_v8  ;;  %v434_v32 = vperm.slane %v3340_v55, %v3287_v8 }
 0x1c3   :  { %1974 = vrot.lane.b32.xlu2 %v426_v0, %s3246_s16  ;;  %v724_v0 = vsel %vm169_vm0, %v708_v27, %v723_v31  ;;  %v3770_v57 = vperm.slane %v722_v28, %v3291_v15  ;;  %v752_v27 = vsel %vm169_vm0, 0.0, %v751_v23  ;;  %v427_v31 = vrot.slane %v420_v40, 4  ;;  %v3792_v23 = vpop.trf.xlu0 }
 0x1c4   :  { %v732_v42 = vperm.slane %v724_v0, %v3291_v15  ;;  %5478 = vst [vmem:[#allocation47_spill] sm:$0xff] %v3792_v23 }
 0x1c5   :  { %v3751_v61 = vpop.permute.xlu2 %1930  ;;  %2146 = vrot.lane.b32.xlu0 %v734_v47, %s3257_s27  ;;  %v761_v47 = vrot.slane %v756_v6, 4  ;;  %v428_v25 = vsel %vm169_vm0, 0.0, %v427_v31 }
 0x1c6   :  { %5474 = vst [vmem:[#allocation43_spill] sm:$0xff] %v3751_v61  ;;  %v3766_v61 = vpop.trf.xlu1  ;;  %v739_v28 = vrot.slane %v732_v42, 4 }
 0x1c7   :  { %5476 = vst [vmem:[#allocation45_spill] sm:$0xff] %v3766_v61  ;;  %v762_v21 = vsel %vm169_vm0, %v761_v47, %v746_v19  ;;  %v449_v61 = vrot.slane %v444_v17, 4 }
 0x1c8   :  { %v3786_v0 = vperm.slane %v762_v21, %v3291_v15 }
 0x1ca   :  { %2154 = vrot.lane.b32.xlu1 %v736_v1, %s3262_s3  ;;  %v760_v1 = vperm.slane %v752_v27, %v3287_v8  ;;  %v740_v27 = vsel %vm169_vm0, 0.0, %v739_v28 }
 0x1cb   :  { %1978 = vrot.lane.b32.xlu2 %v420_v40, %s3245_s15  ;;  %v763_v40 = vrot.slane %v746_v19, 4  ;;  %v808_v19 = vperm.slane %v3378_v22, %v3287_v8 }
 0x1cc   :  { %v773_v21 = vrot.slane %v760_v1, 4 }
 0x1cd   :  { %v3775_v34 = vpop.permute.xlu2 %1934  ;;  %2158 = vrot.lane.b32.xlu0 %v3770_v57, %s5405_s28 }
 0x1ce   :  { %5477 = vst [vmem:[#allocation46_spill] sm:$0xff] %v3775_v34  ;;  %v742_v34 = vsel %vm169_vm0, 0.0, %v741_v63  ;;  %v764_v63 = vsel %vm169_vm0, %v756_v6, %v763_v40  ;;  %v813_v40 = vrot.slane %v808_v19, 4 }
 0x1cf   :  { %v750_v31 = vperm.slane %v742_v34, %v3287_v8  ;;  %v3814_v34 = vperm.slane %v764_v63, %v3291_v15  ;;  %v803_v63 = vrot.slane %v3378_v22, 4 }
 0x1d1   :  { %v774_v37 = vsel %vm169_vm0, %v773_v21, %v750_v31 }
 0x1d2   :  { %2166 = vrot.lane.b32.xlu1 %v732_v42, %s3260_s30  ;;  %v785_v42 = vrot.slane %v3786_v0, 4  ;;  %v780_v6 = vperm.slane %v774_v37, %v3291_v15 }
 0x1d3   :  { %1982 = vrot.lane.b32.xlu2 %v428_v25, %s3247_s17  ;;  %v450_v25 = vsel %vm169_vm0, %v449_v61, %v434_v32 }
 0x1d4   :  { %v3796_v47 = vpop.permute.xlu1 %1906  ;;  %v786_v23 = vsel %vm169_vm0, 0.0, %v785_v42  ;;  %v456_v28 = vperm.slane %v450_v25, %v3291_v15  ;;  %v3823_v42 = vpop.trf.xlu0  ;;  %v789_v25 = vrot.slane %v780_v6, 4 }
 0x1d5   :  { %5479 = vst [vmem:[#allocation48_spill] sm:$0xff] %v3796_v47  ;;  %v3799_v60 = vpop.permute.xlu2 %1938  ;;  %2170 = vrot.lane.b32.xlu0 %v740_v27, %s3261_s2 }
 0x1d6   :  { %5480 = vst [vmem:[#allocation49_spill] sm:$0xff] %v3799_v60  ;;  %v775_v60 = vrot.slane %v750_v31, 4  ;;  %v473_v21 = vrot.slane %v456_v28, 4 }
 0x1d7   :  { %5483 = vst [vmem:[#allocation52_spill] sm:$0xff] %v3823_v42 }
 0x1d8   :  { %v776_v31 = vsel %vm169_vm0, %v760_v1, %v775_v60  ;;  %v474_v42 = vsel %vm169_vm0, 0.0, %v473_v21  ;;  %v790_v60 = vsel %vm169_vm0, 0.0, %v789_v25  ;;  %v804_v1 = vsel %vm169_vm0, 0.0, %v803_v63 }
 0x1d9   :  { %v3830_v47 = vperm.slane %v776_v31, %v3291_v15  ;;  %v812_v31 = vperm.slane %v804_v1, %v3287_v8 }
 0x1da   :  { %2178 = vrot.lane.b32.xlu1 %v786_v23, %s5390_s5  ;;  %v798_v23 = vperm.slane %v3401_v39, %v3287_v8 }
 0x1db   :  { %1986 = vrot.lane.b32.xlu2 %v456_v28, %s3248_s18 }
 0x1dc   :  { %v3816_v61 = vpop.permute.xlu1 %2018  ;;  %v814_v37 = vsel %vm169_vm0, %v813_v40, %v798_v23  ;;  %v815_v41 = vrot.slane %v798_v23, 4  ;;  %v439_v23 = vrot.slane %v3327_v45, 4  ;;  %v825_v45 = vrot.slane %v812_v31, 4 }
 0x1dd   :  { %5481 = vst [vmem:[#allocation50_spill] sm:$0xff] %v3816_v61  ;;  %v3819_v27 = vpop.permute.xlu2 %1942  ;;  %2182 = vrot.lane.b32.xlu0 %v3814_v34, %s3266_s7  ;;  %v793_v61 = vrot.slane %v3401_v39, 4  ;;  %v3841_v22 = vperm.slane %v814_v37, %v3291_v15  ;;  %v791_v39 = vrot.slane %v3830_v47, 4 }
 0x1de   :  { %5482 = vst [vmem:[#allocation51_spill] sm:$0xff] %v3819_v27  ;;  %v451_v27 = vrot.slane %v434_v32, 4 }
 0x1df   :  { %v794_v32 = vsel %vm169_vm0, 0.0, %v793_v61  ;;  %v837_v25 = vrot.slane %v3841_v22, 4  ;;  %v792_v37 = vsel %vm169_vm0, 0.0, %v791_v39 }
 0x1e0   :  { %v802_v63 = vperm.slane %v794_v32, %v3287_v8 }
 0x1e2   :  { %2190 = vrot.lane.b32.xlu1 %v780_v6, %s3268_s9  ;;  %v452_v6 = vsel %vm169_vm0, %v444_v17, %v451_v27  ;;  %v429_v27 = vrot.slane %v3340_v55, 4  ;;  %v827_v1 = vrot.slane %v802_v63, 4 }
 0x1e3   :  { %1990 = vrot.lane.b32.xlu2 %v474_v42, %s3250_s20  ;;  %v816_v42 = vsel %vm169_vm0, %v808_v19, %v815_v41  ;;  %v440_v41 = vsel %vm169_vm0, 0.0, %v439_v23  ;;  %v838_v19 = vsel %vm169_vm0, 0.0, %v837_v25 }
 0x1e4   :  { %v3837_v28 = vpop.permute.xlu1 %2026  ;;  %v3860_v61 = vperm.slane %v816_v42, %v3291_v15  ;;  %v860_v42 = vperm.slane %v3386_v29, %v3287_v8  ;;  %v430_v25 = vsel %vm169_vm0, 0.0, %v429_v27 }
 0x1e5   :  { %5484 = vst [vmem:[#allocation53_spill] sm:$0xff] %v3837_v28  ;;  %v3844_v40 = vpop.permute.xlu2 %1946  ;;  %2194 = vrot.lane.b32.xlu0 %v790_v60, %s3269_s10  ;;  %v460_v60 = vperm.slane %v452_v6, %v3291_v15  ;;  %v448_v6 = vperm.slane %v440_v41, %v3287_v8 }
 0x1e6   :  { %5485 = vst [vmem:[#allocation54_spill] sm:$0xff] %v3844_v40  ;;  %v839_v32 = vrot.slane %v3860_v61, 4  ;;  %v826_v40 = vsel %vm169_vm0, %v825_v45, %v802_v63  ;;  %v865_v28 = vrot.slane %v860_v42, 4  ;;  %v438_v63 = vperm.slane %v430_v25, %v3287_v8 }
 0x1e7   :  { %v3852_v21 = vpop.permute.xlu0 %1902  ;;  %v475_v23 = vrot.slane %v460_v60, 4  ;;  %v850_v45 = vperm.slane %v3412_v52, %v3287_v8 }
 0x1e8   :  { %5486 = vst [vmem:[#allocation55_spill] sm:$0xff] %v3852_v21  ;;  %v840_v55 = vsel %vm169_vm0, 0.0, %v839_v32 }
 0x1e9   :  { %v476_v41 = vsel %vm169_vm0, 0.0, %v475_v23  ;;  %v866_v32 = vsel %vm169_vm0, %v865_v28, %v850_v45  ;;  %v845_v23 = vrot.slane %v3412_v52, 4  ;;  %v867_v28 = vrot.slane %v850_v45, 4 }
 0x1ea   :  { %2202 = vrot.lane.b32.xlu1 %v792_v37, %s3271_s11 }
 0x1eb   :  { %1994 = vrot.lane.b32.xlu2 %v460_v60, %s3249_s19  ;;  %v3887_v60 = vperm.slane %v826_v40, %v3291_v15 }
 0x1ec   :  { %v3865_v17 = vpop.permute.xlu1 %2034 }
 0x1ed   :  { %5487 = vst [vmem:[#allocation56_spill] sm:$0xff] %v3865_v17  ;;  %v3869_v39 = vpop.permute.xlu2 %1950  ;;  %2206 = vrot.lane.b32.xlu0 %v838_v19, %s3242_s0  ;;  %v461_v17 = vrot.slane %v448_v6, 4  ;;  %v855_v19 = vrot.slane %v3386_v29, 4 }
 0x1ee   :  { %5488 = vst [vmem:[#allocation57_spill] sm:$0xff] %v3869_v39  ;;  %v828_v39 = vsel %vm169_vm0, %v812_v31, %v827_v1 }
 0x1ef   :  { %v3876_v37 = vpop.permute.xlu0 %2038  ;;  %v836_v31 = vperm.slane %v828_v39, %v3291_v15  ;;  %v856_v1 = vsel %vm169_vm0, 0.0, %v855_v19  ;;  %v462_v40 = vsel %vm169_vm0, %v461_v17, %v438_v63  ;;  %v846_v19 = vsel %vm169_vm0, 0.0, %v845_v23 }
 0x1f0   :  { %5489 = vst [vmem:[#allocation58_spill] sm:$0xff] %v3876_v37  ;;  %v468_v39 = vperm.slane %v462_v40, %v3291_v15  ;;  %v868_v23 = vsel %vm169_vm0, %v860_v42, %v867_v28  ;;  %v463_v37 = vrot.slane %v438_v63, 4  ;;  %v907_v28 = vrot.slane %v3397_v35, 4 }
 0x1f2   :  { %2214 = vrot.lane.b32.xlu1 %v840_v55, %s3243_s13  ;;  %v843_v55 = vrot.slane %v836_v31, 4  ;;  %v477_v40 = vrot.slane %v468_v39, 4  ;;  %v464_v63 = vsel %vm169_vm0, %v448_v6, %v463_v37  ;;  %v908_v6 = vsel %vm169_vm0, 0.0, %v907_v28 }
 0x1f3   :  { %1998 = vrot.lane.b32.xlu2 %v476_v41, %s3251_s21  ;;  %v864_v41 = vperm.slane %v856_v1, %v3287_v8 }
 0x1f4   :  { %v3892_v27 = vpop.permute.xlu1 %2046  ;;  %v844_v52 = vsel %vm169_vm0, 0.0, %v843_v55  ;;  %v478_v21 = vsel %vm169_vm0, 0.0, %v477_v40  ;;  %v472_v40 = vperm.slane %v464_v63, %v3291_v15 }
 0x1f5   :  { %5490 = vst [vmem:[#allocation59_spill] sm:$0xff] %v3892_v27  ;;  %v3895_v29 = vpop.permute.xlu2 %1954  ;;  %2218 = vrot.lane.b32.xlu0 %v3887_v60, %s3244_s14 }
 0x1f6   :  { %5491 = vst [vmem:[#allocation60_spill] sm:$0xff] %v3895_v29  ;;  %v3908_v29 = vperm.slane %v866_v32, %v3291_v15  ;;  %v854_v32 = vperm.slane %v846_v19, %v3287_v8 }
 0x1f7   :  { %v3903_v25 = vpop.permute.xlu0 %2050 }
 0x1f8   :  { %5492 = vst [vmem:[#allocation61_spill] sm:$0xff] %v3903_v25  ;;  %v877_v25 = vrot.slane %v864_v41, 4  ;;  %v889_v1 = vrot.slane %v3908_v29, 4  ;;  %v879_v55 = vrot.slane %v854_v32, 4 }
 0x1fa   :  { %2226 = vrot.lane.b32.xlu1 %v836_v31, %s3245_s15  ;;  %v890_v45 = vsel %vm169_vm0, 0.0, %v889_v1 }
 0x1fb   :  { %2002 = vrot.lane.b32.xlu2 %v468_v39, %s3252_s22 }
 0x1fc   :  { %v3913_v17 = vpop.permute.xlu1 %2058 }
 0x1fd   :  { %5493 = vst [vmem:[#allocation62_spill] sm:$0xff] %v3913_v17  ;;  %v3916_v27 = vpop.permute.xlu2 %1958  ;;  %2230 = vrot.lane.b32.xlu0 %v844_v52, %s3247_s17  ;;  %v878_v17 = vsel %vm169_vm0, %v877_v25, %v854_v32  ;;  %v3930_v52 = vperm.slane %v868_v23, %v3291_v15  ;;  %v880_v25 = vsel %vm169_vm0, %v864_v41, %v879_v55 }
 0x1fe   :  { %5494 = vst [vmem:[#allocation63_spill] sm:$0xff] %v3916_v27  ;;  %v884_v19 = vperm.slane %v878_v17, %v3291_v15  ;;  %v902_v17 = vperm.slane %v3424_v3, %v3287_v8  ;;  %v3950_v23 = vperm.slane %v880_v25, %v3291_v15  ;;  %v479_v25 = vrot.slane %v472_v40, 4 }
 0x1ff   :  { %v3921_v31 = vpop.permute.xlu0 %2062 }
 0x200   :  { %5495 = vst [vmem:[#allocation64_spill] sm:$0xff] %v3921_v31  ;;  %v893_v32 = vrot.slane %v884_v19, 4  ;;  %v919_v55 = vrot.slane %v902_v17, 4  ;;  %v895_v63 = vrot.slane %v3950_v23, 4 }
 0x202   :  { %2238 = vrot.lane.b32.xlu1 %v890_v45, %s3250_s20  ;;  %v897_v45 = vrot.slane %v3424_v3, 4 }
 0x203   :  { %2006 = vrot.lane.b32.xlu2 %v478_v21, %s3253_s23  ;;  %v912_v21 = vperm.slane %v3397_v35, %v3287_v8  ;;  %v894_v35 = vsel %vm169_vm0, 0.0, %v893_v32  ;;  %v896_v32 = vsel %vm169_vm0, 0.0, %v895_v63 }
 0x204   :  { %v3932_v39 = vpop.permute.xlu1 %2070  ;;  %v898_v31 = vsel %vm169_vm0, 0.0, %v897_v45 }
 0x205   :  { %5496 = vst [vmem:[#allocation65_spill] sm:$0xff] %v3932_v39  ;;  %v3935_v42 = vpop.permute.xlu2 %1962  ;;  %2242 = vrot.lane.b32.xlu0 %v3930_v52, %s3249_s19  ;;  %v917_v37 = vrot.slane %v912_v21, 4  ;;  %v920_v3 = vsel %vm169_vm0, %v912_v21, %v919_v55  ;;  %v525_v21 = vrot.slane %v3490_v50, 4 }
 0x206   :  { %5497 = vst [vmem:[#allocation66_spill] sm:$0xff] %v3935_v42 }
 0x207   :  { %v3942_v1 = vpop.permute.xlu0 %2074  ;;  %v918_v39 = vsel %vm169_vm0, %v917_v37, %v902_v17  ;;  %v928_v17 = vperm.slane %v920_v3, %v3291_v15 }
 0x208   :  { %5498 = vst [vmem:[#allocation67_spill] sm:$0xff] %v3942_v1 }
 0x209   :  { %v943_v63 = vrot.slane %v928_v17, 4 }
 0x20a   :  { %2250 = vrot.lane.b32.xlu1 %v884_v19, %s3252_s22  ;;  %v916_v19 = vperm.slane %v908_v6, %v3287_v8  ;;  %v3974_v6 = vperm.slane %v918_v39, %v3291_v15  ;;  %v964_v39 = vperm.slane %v3408_v49, %v3287_v8 }
 0x20b   :  { %2010 = vrot.lane.b32.xlu2 %v472_v40, %s3254_s24  ;;  %v906_v40 = vperm.slane %v898_v31, %v3287_v8  ;;  %v944_v50 = vsel %vm169_vm0, 0.0, %v943_v63 }
 0x20c   :  { %v3955_v41 = vpop.permute.xlu1 %2082  ;;  %v929_v42 = vrot.slane %v916_v19, 4 }
 0x20d   :  { %v3959_v1 = vpop.permute.xlu2 %1966  ;;  %2254 = vrot.lane.b32.xlu0 %v894_v35, %s3253_s23  ;;  %v480_v35 = vsel %vm169_vm0, 0.0, %v479_v25  ;;  %v526_v25 = vsel %vm169_vm0, 0.0, %v525_v21 }
 0x20e   :  { %5499 = vst [vmem:[#allocation68_spill] sm:$0xff] %v3959_v1  ;;  %v930_v45 = vsel %vm169_vm0, %v929_v42, %v906_v40  ;;  %v969_v42 = vrot.slane %v964_v39, 4 }
 0x20f   :  { %v3964_v28 = vpop.permute.xlu0 %2086  ;;  %v3991_v31 = vperm.slane %v930_v45, %v3291_v15  ;;  %v954_v45 = vperm.slane %v3435_v12, %v3287_v8 }
 0x211   :  { %v970_v63 = vsel %vm169_vm0, %v969_v42, %v954_v45 }
 0x212   :  { %2262 = vrot.lane.b32.xlu1 %v896_v32, %s3255_s25  ;;  %v931_v32 = vrot.slane %v906_v40, 4 }
 0x213   :  { %2014 = vrot.lane.b32.xlu2 %v480_v35, %s3255_s25 }
 0x214   :  { %v3977_v1 = vpop.permute.xlu1 %2094  ;;  %v932_v40 = vsel %vm169_vm0, %v916_v19, %v931_v32 }
 0x215   :  { %v3980_v37 = vpop.permute.xlu2 %1970  ;;  %2266 = vrot.lane.b32.xlu0 %v3974_v6, %s3256_s26 }
 0x216   :  { %5500 = vst [vmem:[#allocation69_spill] sm:$0xff] %v3980_v37  ;;  %v945_v37 = vrot.slane %v3991_v31, 4 }
 0x217   :  { %v3986_v55 = vpop.permute.xlu0 %2098 }
 0x218   :  { %v946_v27 = vsel %vm169_vm0, 0.0, %v945_v37 }
 0x21a   :  { %2274 = vrot.lane.b32.xlu1 %v928_v17, %s3265_s6  ;;  %v527_v17 = vrot.slane %v3505_v16, 4  ;;  %v4017_v16 = vperm.slane %v932_v40, %v3291_v15 }
 0x21b   :  { %2022 = vrot.lane.b32.xlu2 %v526_v25, %s3257_s27  ;;  %v959_v25 = vrot.slane %v3408_v49, 4  ;;  %v976_v49 = vperm.slane %v970_v63, %v3291_v15 }
 0x21c   :  { %v3996_v3 = vpop.permute.xlu1 %2106 }
 0x21d   :  { %5501 = vst [vmem:[#allocation70_spill] sm:$0xff] %v3996_v3  ;;  %v3999_v35 = vpop.permute.xlu2 %1974  ;;  %2278 = vrot.lane.b32.xlu0 %v944_v50, %s3262_s3  ;;  %v971_v50 = vrot.slane %v954_v45, 4  ;;  %v528_v3 = vsel %vm169_vm0, 0.0, %v527_v17  ;;  %v960_v19 = vsel %vm169_vm0, 0.0, %v959_v25  ;;  %v993_v42 = vrot.slane %v976_v49, 4 }
 0x21e   :  { %5502 = vst [vmem:[#allocation71_spill] sm:$0xff] %v3999_v35  ;;  %v949_v35 = vrot.slane %v3435_v12, 4 }
 0x21f   :  { %v4006_v21 = vpop.permute.xlu0 %2110 }
 0x220   :  { %5503 = vst [vmem:[#allocation72_spill] sm:$0xff] %v4006_v21  ;;  %v950_v12 = vsel %vm169_vm0, 0.0, %v949_v35 }
 0x221   :  { %v958_v45 = vperm.slane %v950_v12, %v3287_v8  ;;  %v1011_v12 = vrot.slane %v3418_v58, 4 }
 0x222   :  { %2286 = vrot.lane.b32.xlu1 %v946_v27, %s3259_s29  ;;  %v972_v27 = vsel %vm169_vm0, %v964_v39, %v971_v50  ;;  %v994_v39 = vsel %vm169_vm0, 0.0, %v993_v42 }
 0x223   :  { %2030 = vrot.lane.b32.xlu2 %v528_v3, %s3262_s3  ;;  %v968_v3 = vperm.slane %v960_v19, %v3287_v8  ;;  %v4034_v17 = vperm.slane %v972_v27, %v3291_v15  ;;  %v983_v35 = vrot.slane %v958_v45, 4  ;;  %v577_v19 = vrot.slane %v3562_v44, 4 }
 0x224   :  { %v4019_v21 = vpop.permute.xlu1 %2118  ;;  %v4053_v27 = vperm.slane %v3441_v18, %v3287_v8  ;;  %v1012_v44 = vsel %vm169_vm0, 0.0, %v1011_v12 }
 0x225   :  { %v4023_v32 = vpop.permute.xlu2 %1978  ;;  %2290 = vrot.lane.b32.xlu0 %v4017_v16, %s3260_s30  ;;  %v981_v40 = vrot.slane %v968_v3, 4  ;;  %v995_v50 = vrot.slane %v4034_v17, 4  ;;  %v1020_v12 = vperm.slane %v1012_v44, %v3287_v8 }
 0x227   :  { %v4029_v37 = vpop.permute.xlu0 %2122  ;;  %v996_v42 = vsel %vm169_vm0, 0.0, %v995_v50  ;;  %v4069_v50 = vperm.slane %v3418_v58, %v3287_v8 }
 0x228   :  { %5504 = vst [vmem:[#allocation73_spill] sm:$0xff] %v4029_v37 }
 0x22a   :  { %2298 = vrot.lane.b32.xlu1 %v976_v49, %s3263_s4 }
 0x22b   :  { %2042 = vrot.lane.b32.xlu2 %v3532_v54, %s3260_s30  ;;  %v982_v54 = vsel %vm169_vm0, %v981_v40, %v958_v45 }
 0x22c   :  { %v4039_v25 = vpop.permute.xlu1 %2130 }
 0x22d   :  { %5505 = vst [vmem:[#allocation74_spill] sm:$0xff] %v4039_v25  ;;  %v4042_v63 = vpop.permute.xlu2 %1982  ;;  %2302 = vrot.lane.b32.xlu0 %v994_v39, %s5390_s5  ;;  %v984_v25 = vsel %vm169_vm0, %v968_v3, %v983_v35  ;;  %v578_v39 = vsel %vm169_vm0, 0.0, %v577_v19  ;;  %v1001_v3 = vrot.slane %v3441_v18, 4  ;;  %v1023_v35 = vrot.slane %v4053_v27, 4 }
 0x22e   :  { %v992_v40 = vperm.slane %v984_v25, %v3291_v15 }
 0x22f   :  { %v4048_v49 = vpop.permute.xlu0 %2134  ;;  %v1002_v25 = vsel %vm169_vm0, 0.0, %v1001_v3  ;;  %v1024_v58 = vsel %vm169_vm0, %v4069_v50, %v1023_v35  ;;  %v583_v3 = vrot.slane %v3612_v26, 4 }
 0x230   :  { %5506 = vst [vmem:[#allocation75_spill] sm:$0xff] %v4048_v49  ;;  %v4062_v49 = vperm.slane %v982_v54, %v3291_v15  ;;  %v1010_v18 = vperm.slane %v1002_v25, %v3287_v8 }
 0x232   :  { %2310 = vrot.lane.b32.xlu1 %v996_v42, %s3267_s8  ;;  %v999_v42 = vrot.slane %v992_v40, 4 }
 0x233   :  { %2054 = vrot.lane.b32.xlu2 %v578_v39, %s5390_s5  ;;  %v1033_v39 = vrot.slane %v1020_v12, 4  ;;  %s5510_s5 = smov 120  }
 0x234   :  { %v4064_v45 = vpop.permute.xlu1 %2142  ;;  %v1000_v44 = vsel %vm169_vm0, 0.0, %v999_v42  ;;  %v584_v42 = vsel %vm169_vm0, 0.0, %v583_v3 }
 0x235   :  { %5507 = vst [vmem:[#allocation76_spill] sm:$0xff] %v4064_v45  ;;  %v4073_v19 = vpop.permute.xlu2 %1986  ;;  %2314 = vrot.lane.b32.xlu0 %v4062_v49, %s3268_s9  ;;  %v1034_v35 = vsel %vm169_vm0, %v1033_v39, %v1010_v18 }
 0x236   :  { %5508 = vst [vmem:[#allocation77_spill] sm:$0xff] %v4073_v19  ;;  %v4101_v25 = vperm.slane %v1034_v35, %v3291_v15  ;;  %v1058_v35 = vperm.slane %v3451_v38, %v3287_v8 }
 0x237   :  { %v4078_v54 = vpop.permute.xlu0 %2146 }
 0x238   :  { %5509 = vst [vmem:[#allocation78_spill] sm:$0xff] %v4078_v54  ;;  %v1032_v54 = vperm.slane %v1024_v58, %v3291_v15  ;;  %v1035_v58 = vrot.slane %v1010_v18, 4 }
 0x23a   :  { %2322 = vrot.lane.b32.xlu1 %v992_v40, %s5510_s5  ;;  %v1047_v37 = vrot.slane %v1032_v54, 4  ;;  %v1036_v18 = vsel %vm169_vm0, %v1020_v12, %v1035_v58 }
 0x23b   :  { %2066 = vrot.lane.b32.xlu2 %v3579_v56, %s3268_s9  ;;  %v1068_v56 = vperm.slane %v3433_v10, %v3287_v8 }
 0x23c   :  { %v4087_v45 = vpop.permute.xlu1 %2154  ;;  %v1048_v26 = vsel %vm169_vm0, 0.0, %v1047_v37 }
 0x23d   :  { %5511 = vst [vmem:[#allocation79_spill] sm:$0xff] %v4087_v45  ;;  %v4091_v19 = vpop.permute.xlu2 %1990  ;;  %2326 = vrot.lane.b32.xlu0 %v1000_v44, %s3271_s11  ;;  %v1073_v39 = vrot.slane %v1068_v56, 4  ;;  %v1049_v45 = vrot.slane %v4101_v25, 4 }
 0x23e   :  { %5512 = vst [vmem:[#allocation80_spill] sm:$0xff] %v4091_v19 }
 0x23f   :  { %v4096_v40 = vpop.permute.xlu0 %2158  ;;  %v1074_v37 = vsel %vm169_vm0, %v1073_v39, %v1058_v35 }
 0x240   :  { %5513 = vst [vmem:[#allocation81_spill] sm:$0xff] %v4096_v40 }
 0x242   :  { %2334 = vrot.lane.b32.xlu1 %v1032_v54, %s3239_s12  ;;  %v631_v54 = vrot.slane %v3633_v30, 4  ;;  %v4127_v30 = vperm.slane %v1036_v18, %v3291_v15 }
 0x243   :  { %2078 = vrot.lane.b32.xlu2 %v584_v42, %s3271_s11  ;;  %v1063_v42 = vrot.slane %v3433_v10, 4  ;;  %v1080_v10 = vperm.slane %v1074_v37, %v3291_v15 }
 0x244   :  { %v4106_v44 = vpop.permute.xlu1 %2166  ;;  %v632_v19 = vsel %vm169_vm0, 0.0, %v631_v54 }
 0x245   :  { %5514 = vst [vmem:[#allocation82_spill] sm:$0xff] %v4106_v44  ;;  %v4109_v40 = vpop.permute.xlu2 %1994  ;;  %2338 = vrot.lane.b32.xlu0 %v1048_v26, %s3243_s13  ;;  %v1050_v44 = vsel %vm169_vm0, 0.0, %v1049_v45  ;;  %v1075_v26 = vrot.slane %v1058_v35, 4  ;;  %v1064_v12 = vsel %vm169_vm0, 0.0, %v1063_v42  ;;  %v1097_v39 = vrot.slane %v1080_v10, 4 }
 0x246   :  { %5515 = vst [vmem:[#allocation83_spill] sm:$0xff] %v4109_v40  ;;  %v1053_v40 = vrot.slane %v3451_v38, 4 }
 0x247   :  { %v4116_v3 = vpop.permute.xlu0 %2170  ;;  %v1076_v45 = vsel %vm169_vm0, %v1068_v56, %v1075_v26 }
 0x248   :  { %5516 = vst [vmem:[#allocation84_spill] sm:$0xff] %v4116_v3  ;;  %v1054_v38 = vsel %vm169_vm0, 0.0, %v1053_v40  ;;  %v4144_v54 = vperm.slane %v1076_v45, %v3291_v15  ;;  %v1098_v40 = vsel %vm169_vm0, 0.0, %v1097_v39 }
 0x249   :  { %v1062_v35 = vperm.slane %v1054_v38, %v3287_v8 }
 0x24a   :  { %2346 = vrot.lane.b32.xlu1 %v1050_v44, %s3246_s16  ;;  %v1099_v26 = vrot.slane %v4144_v54, 4 }
 0x24b   :  { %2090 = vrot.lane.b32.xlu2 %v632_v19, %s3243_s13  ;;  %v1072_v19 = vperm.slane %v1064_v12, %v3287_v8  ;;  %v1087_v56 = vrot.slane %v1062_v35, 4  ;;  %v1120_v12 = vperm.slane %v3443_v20, %v3287_v8 }
 0x24c   :  { %v4129_v3 = vpop.permute.xlu1 %2178  ;;  %v1100_v45 = vsel %vm169_vm0, 0.0, %v1099_v26  ;;  %v1105_v26 = vrot.slane %v3468_v4, 4 }
 0x24d   :  { %5517 = vst [vmem:[#allocation85_spill] sm:$0xff] %v4129_v3  ;;  %v4133_v58 = vpop.permute.xlu2 %1998  ;;  %2350 = vrot.lane.b32.xlu0 %v4127_v30, %s3245_s15  ;;  %v1085_v18 = vrot.slane %v1072_v19, 4  ;;  %v1088_v39 = vsel %vm169_vm0, %v1072_v19, %v1087_v56 }
 0x24e   :  { %5518 = vst [vmem:[#allocation86_spill] sm:$0xff] %v4133_v58 }
 0x24f   :  { %v4139_v44 = vpop.permute.xlu0 %2182 }
 0x250   :  { %5519 = vst [vmem:[#allocation87_spill] sm:$0xff] %v4139_v44  ;;  %v1125_v44 = vrot.slane %v1120_v12, 4 }
 0x252   :  { %2358 = vrot.lane.b32.xlu1 %v1080_v10, %s3248_s18  ;;  %v681_v10 = vrot.slane %v3680_v11, 4  ;;  %v1110_v11 = vperm.slane %v3468_v4, %v3287_v8 }
 0x253   :  { %2102 = vrot.lane.b32.xlu2 %v3652_v2, %s3245_s15  ;;  %v1086_v2 = vsel %vm169_vm0, %v1085_v18, %v1062_v35  ;;  %v1096_v18 = vperm.slane %v1088_v39, %v3291_v15  ;;  %v1106_v39 = vsel %vm169_vm0, 0.0, %v1105_v26 }
 0x254   :  { %v4149_v42 = vpop.permute.xlu1 %2190  ;;  %v4169_v3 = vperm.slane %v1086_v2, %v3291_v15  ;;  %v1126_v56 = vsel %vm169_vm0, %v1125_v44, %v1110_v11 }
 0x255   :  { %5520 = vst [vmem:[#allocation88_spill] sm:$0xff] %v4149_v42  ;;  %v4152_v37 = vpop.permute.xlu2 %2002  ;;  %2362 = vrot.lane.b32.xlu0 %v1098_v40, %s3250_s20  ;;  %v1115_v42 = vrot.slane %v3443_v20, 4  ;;  %v682_v40 = vsel %vm169_vm0, 0.0, %v681_v10  ;;  %v1103_v2 = vrot.slane %v1096_v18, 4 }
 0x256   :  { %5521 = vst [vmem:[#allocation89_spill] sm:$0xff] %v4152_v37 }
 0x257   :  { %v4159_v38 = vpop.permute.xlu0 %2194  ;;  %v1116_v20 = vsel %vm169_vm0, 0.0, %v1115_v42  ;;  %v1127_v42 = vrot.slane %v1110_v11, 4  ;;  %v1104_v4 = vsel %vm169_vm0, 0.0, %v1103_v2 }
 0x258   :  { %5522 = vst [vmem:[#allocation90_spill] sm:$0xff] %v4159_v38 }
 0x25a   :  { %2370 = vrot.lane.b32.xlu1 %v1100_v45, %s3251_s21  ;;  %v1124_v45 = vperm.slane %v1116_v20, %v3287_v8 }
 0x25b   :  { %2114 = vrot.lane.b32.xlu2 %v682_v40, %s3250_s20  ;;  %v4187_v40 = vperm.slane %v1126_v56, %v3291_v15  ;;  %v1114_v56 = vperm.slane %v1106_v39, %v3287_v8 }
 0x25c   :  { %v4173_v35 = vpop.permute.xlu1 %2202  ;;  %v1137_v44 = vrot.slane %v1124_v45, 4 }
 0x25d   :  { %5523 = vst [vmem:[#allocation91_spill] sm:$0xff] %v4173_v35  ;;  %v4176_v19 = vpop.permute.xlu2 %2006  ;;  %2374 = vrot.lane.b32.xlu0 %v4169_v3, %s3252_s22  ;;  %v1149_v20 = vrot.slane %v4187_v40, 4  ;;  %v1139_v2 = vrot.slane %v1114_v56, 4 }
 0x25e   :  { %5524 = vst [vmem:[#allocation92_spill] sm:$0xff] %v4176_v19  ;;  %v1138_v19 = vsel %vm169_vm0, %v1137_v44, %v1114_v56  ;;  %v1162_v56 = vperm.slane %v3487_v59, %v3287_v8 }
 0x25f   :  { %v4183_v10 = vpop.permute.xlu0 %2206  ;;  %5525 = vst [vmem:[#allocation93_spill] sm:$0xff] %v4187_v40  ;;  %v1150_v11 = vsel %vm169_vm0, 0.0, %v1149_v20 }
 0x262   :  { %2382 = vrot.lane.b32.xlu1 %v1096_v18, %s3254_s24  ;;  %v687_v18 = vrot.slane %v3725_v9, 4  ;;  %v1144_v9 = vperm.slane %v1138_v19, %v3291_v15 }
 0x263   :  { %2126 = vrot.lane.b32.xlu2 %v3700_v24, %s3252_s22  ;;  %v1128_v24 = vsel %vm169_vm0, %v1120_v12, %v1127_v42  ;;  %v1140_v12 = vsel %vm169_vm0, %v1124_v45, %v1139_v2  ;;  %v1167_v42 = vrot.slane %v3453_v46, 4  ;;  %v1179_v2 = vrot.slane %v1162_v56, 4 }
 0x264   :  { %v4193_v35 = vpop.permute.xlu1 %2214  ;;  %v1153_v20 = vrot.slane %v1144_v9, 4  ;;  %v4229_v19 = vperm.slane %v1140_v12, %v3291_v15 }
 0x265   :  { %v4196_v38 = vpop.permute.xlu2 %2010  ;;  %2386 = vrot.lane.b32.xlu0 %v1104_v4, %s3255_s25  ;;  %v4211_v4 = vperm.slane %v1128_v24, %v3291_v15 }
 0x266   :  { %5526 = vst [vmem:[#allocation94_spill] sm:$0xff] %v4196_v38  ;;  %v688_v38 = vsel %vm169_vm0, 0.0, %v687_v18  ;;  %v1168_v18 = vsel %vm169_vm0, 0.0, %v1167_v42  ;;  %v1155_v12 = vrot.slane %v4229_v19, 4  ;;  %v737_v42 = vrot.slane %v3770_v57, 4 }
 0x267   :  { %v4202_v26 = vpop.permute.xlu0 %2218  ;;  %5527 = vst [vmem:[#allocation95_spill] sm:$0xff] %v4211_v4 }
 0x268   :  { %5529 = vst [vmem:[#allocation97_spill] sm:$0xff] %v4229_v19 }
 0x26a   :  { %2394 = vrot.lane.b32.xlu1 %v1150_v11, %s3257_s27  ;;  %v1154_v11 = vsel %vm169_vm0, 0.0, %v1153_v20  ;;  %v1156_v20 = vsel %vm169_vm0, 0.0, %v1155_v12 }
 0x26b   :  { %2138 = vrot.lane.b32.xlu2 %v688_v38, %s3255_s25  ;;  %v1172_v38 = vperm.slane %v3453_v46, %v3287_v8  ;;  %v1157_v46 = vrot.slane %v3487_v59, 4 }
 0x26c   :  { %v4213_v39 = vpop.permute.xlu1 %2226 }
 0x26d   :  { %v4216_v37 = vpop.permute.xlu2 %2014  ;;  %2398 = vrot.lane.b32.xlu0 %v4211_v4, %s3265_s6  ;;  %v1177_v45 = vrot.slane %v1172_v38, 4  ;;  %v1158_v58 = vsel %vm169_vm0, 0.0, %v1157_v46  ;;  %v1180_v59 = vsel %vm169_vm0, %v1172_v38, %v1179_v2  ;;  %v1224_v38 = vperm.slane %v3471_v7, %v3287_v8 }
 0x26e   :  { %5528 = vst [vmem:[#allocation96_spill] sm:$0xff] %v4216_v37  ;;  %v1166_v57 = vperm.slane %v1158_v58, %v3287_v8  ;;  %v1219_v58 = vrot.slane %v3471_v7, 4 }
 0x26f   :  { %v4222_v44 = vpop.permute.xlu0 %2230 }
 0x272   :  { %2406 = vrot.lane.b32.xlu1 %v1144_v9, %s5405_s28  ;;  %v1176_v9 = vperm.slane %v1168_v18, %v3287_v8 }
 0x273   :  { %2150 = vrot.lane.b32.xlu2 %v3745_v48, %s3265_s6  ;;  %v1178_v48 = vsel %vm169_vm0, %v1177_v45, %v1162_v56  ;;  %v1188_v56 = vperm.slane %v1180_v59, %v3291_v15  ;;  %v1214_v59 = vperm.slane %v3510_v43, %v3287_v8 }
 0x274   :  { %v4235_v24 = vpop.permute.xlu1 %2238  ;;  %v1189_v40 = vrot.slane %v1176_v9, 4  ;;  %v4255_v18 = vperm.slane %v1178_v48, %v3291_v15  ;;  %v1229_v48 = vrot.slane %v1224_v38, 4 }
 0x275   :  { %v4239_v37 = vpop.permute.xlu2 %2022  ;;  %2410 = vrot.lane.b32.xlu0 %v1154_v11, %s3259_s29  ;;  %v738_v11 = vsel %vm169_vm0, 0.0, %v737_v42  ;;  %v1203_v12 = vrot.slane %v1188_v56, 4 }
 0x276   :  { %5530 = vst [vmem:[#allocation98_spill] sm:$0xff] %v4255_v18  ;;  %v1190_v46 = vsel %vm169_vm0, %v1189_v40, %v1166_v57 }
 0x277   :  { %v4245_v4 = vpop.permute.xlu0 %2242  ;;  %v4271_v42 = vperm.slane %v1190_v46, %v3291_v15  ;;  %v1204_v40 = vsel %vm169_vm0, 0.0, %v1203_v12  ;;  %v1220_v46 = vsel %vm169_vm0, 0.0, %v1219_v58 }
 0x278   :  { %v1228_v12 = vperm.slane %v1220_v46, %v3287_v8 }
 0x279   :  { %5532 = vst [vmem:[#allocation100_spill] sm:$0xff] %v4271_v42  ;;  %v1205_v7 = vrot.slane %v4271_v42, 4 }
 0x27a   :  { %2418 = vrot.lane.b32.xlu1 %v1156_v20, %s3261_s2  ;;  %v1191_v20 = vrot.slane %v1166_v57, 4  ;;  %v1209_v57 = vrot.slane %v3510_v43, 4 }
 0x27b   :  { %2162 = vrot.lane.b32.xlu2 %v738_v11, %s3259_s29 }
 0x27c   :  { %v4258_v19 = vpop.permute.xlu1 %2250 }
 0x27d   :  { %v4261_v45 = vpop.permute.xlu2 %2030  ;;  %2422 = vrot.lane.b32.xlu0 %v4255_v18, %s3263_s4 }
 0x27e   :  { %5531 = vst [vmem:[#allocation99_spill] sm:$0xff] %v4261_v45 }
 0x27f   :  { %v4268_v2 = vpop.permute.xlu0 %2254 }
 0x282   :  { %2430 = vrot.lane.b32.xlu1 %v1188_v56, %s3266_s7  ;;  %v1230_v56 = vsel %vm169_vm0, %v1229_v48, %v1214_v59  ;;  %v1210_v48 = vsel %vm169_vm0, 0.0, %v1209_v57 }
 0x283   :  { %2174 = vrot.lane.b32.xlu2 %v3786_v0, %s3263_s4  ;;  %v787_v0 = vrot.slane %v3814_v34, 4  ;;  %v1231_v34 = vrot.slane %v1214_v59, 4 }
 0x284   :  { %v4279_v11 = vpop.permute.xlu1 %2262 }
 0x285   :  { %5533 = vst [vmem:[#allocation101_spill] sm:$0xff] %v4279_v11  ;;  %v4282_v18 = vpop.permute.xlu2 %2042  ;;  %2434 = vrot.lane.b32.xlu0 %v1204_v40, %s3267_s8  ;;  %v1192_v11 = vsel %vm169_vm0, %v1176_v9, %v1191_v20  ;;  %v4296_v40 = vperm.slane %v1230_v56, %v3291_v15  ;;  %v788_v58 = vsel %vm169_vm0, 0.0, %v787_v0  ;;  %v1241_v20 = vrot.slane %v1228_v12, 4 }
 0x286   :  { %5534 = vst [vmem:[#allocation102_spill] sm:$0xff] %v4282_v18  ;;  %v1206_v18 = vsel %vm169_vm0, 0.0, %v1205_v7  ;;  %v4303_v43 = vperm.slane %v1192_v11, %v3291_v15  ;;  %v1218_v7 = vperm.slane %v1210_v48, %v3287_v8  ;;  %v1232_v0 = vsel %vm169_vm0, %v1224_v38, %v1231_v34 }
 0x287   :  { %v4290_v45 = vpop.permute.xlu0 %2266  ;;  %v1271_v34 = vrot.slane %v3492_v5, 4 }
 0x288   :  { %5535 = vst [vmem:[#allocation103_spill] sm:$0xff] %v4303_v43  ;;  %v1242_v59 = vsel %vm169_vm0, %v1241_v20, %v1218_v7  ;;  %v1243_v57 = vrot.slane %v1218_v7, 4  ;;  %v1266_v7 = vperm.slane %v3539_v13, %v3287_v8 }
 0x289   :  { %v1248_v48 = vperm.slane %v1242_v59, %v3291_v15 }
 0x28a   :  { %2442 = vrot.lane.b32.xlu1 %v1206_v18, %s3269_s10  ;;  %v1253_v18 = vrot.slane %v4296_v40, 4  ;;  %v1244_v38 = vsel %vm169_vm0, %v1228_v12, %v1243_v57 }
 0x28b   :  { %2186 = vrot.lane.b32.xlu2 %v788_v58, %s3267_s8  ;;  %v4322_v58 = vperm.slane %v1232_v0, %v3291_v15  ;;  %v4340_v0 = vperm.slane %v1244_v38, %v3291_v15 }
 0x28c   :  { %v4305_v9 = vpop.permute.xlu1 %2274  ;;  %v1254_v11 = vsel %vm169_vm0, 0.0, %v1253_v18  ;;  %v1257_v18 = vrot.slane %v1248_v48, 4 }
 0x28d   :  { %v4307_v46 = vpop.permute.xlu2 %2054  ;;  %2446 = vrot.lane.b32.xlu0 %v4303_v43, %s5510_s5  ;;  %5537 = vst [vmem:[#allocation105_spill] sm:$0xff] %v4322_v58  ;;  %v1259_v38 = vrot.slane %v4340_v0, 4 }
 0x28e   :  { %5536 = vst [vmem:[#allocation104_spill] sm:$0xff] %v4307_v46  ;;  %v1258_v57 = vsel %vm169_vm0, 0.0, %v1257_v18 }
 0x28f   :  { %v4313_v56 = vpop.permute.xlu0 %2278  ;;  %5540 = vst [vmem:[#allocation108_spill] sm:$0xff] %v4340_v0  ;;  %v1260_v18 = vsel %vm169_vm0, 0.0, %v1259_v38  ;;  %v1328_v38 = vperm.slane %v3512_v53, %v3287_v8 }
 0x292   :  { %2454 = vrot.lane.b32.xlu1 %v1254_v11, %s3242_s0  ;;  %v1272_v11 = vsel %vm169_vm0, 0.0, %v1271_v34  ;;  %v841_v34 = vrot.slane %v3887_v60, 4 }
 0x293   :  { %2198 = vrot.lane.b32.xlu2 %v3830_v47, %s5510_s5  ;;  %v1276_v47 = vperm.slane %v3492_v5, %v3287_v8  ;;  %v1261_v5 = vrot.slane %v3539_v13, 4 }
 0x294   :  { %v4324_v43 = vpop.permute.xlu1 %2286 }
 0x295   :  { %v4327_v42 = vpop.permute.xlu2 %2066  ;;  %2458 = vrot.lane.b32.xlu0 %v4322_v58, %s3239_s12  ;;  %v1281_v12 = vrot.slane %v1276_v47, 4  ;;  %v1283_v58 = vrot.slane %v1266_v7, 4 }
 0x296   :  { %5538 = vst [vmem:[#allocation106_spill] sm:$0xff] %v4327_v42 }
 0x297   :  { %v4333_v20 = vpop.permute.xlu0 %2290  ;;  %v1284_v13 = vsel %vm169_vm0, %v1276_v47, %v1283_v58 }
 0x298   :  { %5539 = vst [vmem:[#allocation107_spill] sm:$0xff] %v4333_v20 }
 0x29a   :  { %2466 = vrot.lane.b32.xlu1 %v1248_v48, %s3244_s14  ;;  %v1280_v48 = vperm.slane %v1272_v11, %v3287_v8 }
 0x29b   :  { %2210 = vrot.lane.b32.xlu2 %v3860_v61, %s3239_s12  ;;  %v1282_v61 = vsel %vm169_vm0, %v1281_v12, %v1266_v7  ;;  %v1292_v7 = vperm.slane %v1284_v13, %v3291_v15 }
 0x29c   :  { %v4346_v59 = vpop.permute.xlu1 %2298  ;;  %v1293_v46 = vrot.slane %v1280_v48, 4  ;;  %v4366_v11 = vperm.slane %v1282_v61, %v3291_v15 }
 0x29d   :  { %5541 = vst [vmem:[#allocation109_spill] sm:$0xff] %v4346_v59  ;;  %v4350_v42 = vpop.permute.xlu2 %2078  ;;  %2470 = vrot.lane.b32.xlu0 %v1258_v57, %s3246_s16  ;;  %v1262_v59 = vsel %vm169_vm0, 0.0, %v1261_v5  ;;  %v842_v57 = vsel %vm169_vm0, 0.0, %v841_v34  ;;  %v1307_v5 = vrot.slane %v1292_v7, 4 }
 0x29e   :  { %5542 = vst [vmem:[#allocation110_spill] sm:$0xff] %v4366_v11  ;;  %v1270_v60 = vperm.slane %v1262_v59, %v3287_v8 }
 0x29f   :  { %v4356_v20 = vpop.permute.xlu0 %2302 }
 0x2a0   :  { %v1294_v58 = vsel %vm169_vm0, %v1293_v46, %v1270_v60  ;;  %v1295_v59 = vrot.slane %v1270_v60, 4  ;;  %v1333_v46 = vrot.slane %v1328_v38, 4  ;;  %v1323_v60 = vrot.slane %v3512_v53, 4 }
 0x2a1   :  { %v4382_v34 = vperm.slane %v1294_v58, %v3291_v15  ;;  %v1318_v58 = vperm.slane %v3567_v33, %v3287_v8 }
 0x2a2   :  { %2478 = vrot.lane.b32.xlu1 %v1260_v18, %s3247_s17  ;;  %v1308_v18 = vsel %vm169_vm0, 0.0, %v1307_v5 }
 0x2a3   :  { %2222 = vrot.lane.b32.xlu2 %v842_v57, %s3246_s16  ;;  %5544 = vst [vmem:[#allocation112_spill] sm:$0xff] %v4382_v34  ;;  %v1309_v57 = vrot.slane %v4382_v34, 4  ;;  %v1334_v5 = vsel %vm169_vm0, %v1333_v46, %v1318_v58 }
 0x2a4   :  { %v4369_v0 = vpop.permute.xlu1 %2310  ;;  %v1340_v53 = vperm.slane %v1334_v5, %v3291_v15 }
 0x2a5   :  { %v4372_v12 = vpop.permute.xlu2 %2090  ;;  %2482 = vrot.lane.b32.xlu0 %v4366_v11, %s3248_s18 }
 0x2a7   :  { %v4377_v47 = vpop.permute.xlu0 %2314 }
 0x2a8   :  { %5543 = vst [vmem:[#allocation111_spill] sm:$0xff] %v4377_v47  ;;  %v1313_v47 = vrot.slane %v3567_v33, 4 }
 0x2aa   :  { %2490 = vrot.lane.b32.xlu1 %v1292_v7, %s3249_s19  ;;  %v891_v7 = vrot.slane %v3930_v52, 4  ;;  %v1314_v33 = vsel %vm169_vm0, 0.0, %v1313_v47 }
 0x2ab   :  { %2234 = vrot.lane.b32.xlu2 %v3908_v29, %s3248_s18  ;;  %v1296_v29 = vsel %vm169_vm0, %v1280_v48, %v1295_v59  ;;  %v1324_v48 = vsel %vm169_vm0, 0.0, %v1323_v60 }
 0x2ac   :  { %v4387_v61 = vpop.permute.xlu1 %2322  ;;  %v892_v34 = vsel %vm169_vm0, 0.0, %v891_v7  ;;  %v4408_v52 = vperm.slane %v1296_v29, %v3291_v15 }
 0x2ad   :  { %5545 = vst [vmem:[#allocation113_spill] sm:$0xff] %v4387_v61  ;;  %v4390_v13 = vpop.permute.xlu2 %2102  ;;  %2494 = vrot.lane.b32.xlu0 %v1308_v18, %s3251_s21  ;;  %v1310_v61 = vsel %vm169_vm0, 0.0, %v1309_v57  ;;  %v1335_v18 = vrot.slane %v1318_v58, 4  ;;  %v1357_v57 = vrot.slane %v1340_v53, 4  ;;  %v1322_v58 = vperm.slane %v1314_v33, %v3287_v8 }
 0x2ae   :  { %5547 = vst [vmem:[#allocation115_spill] sm:$0xff] %v4408_v52 }
 0x2af   :  { %v4397_v11 = vpop.permute.xlu0 %2326  ;;  %v1358_v47 = vsel %vm169_vm0, 0.0, %v1357_v57 }
 0x2b0   :  { %5546 = vst [vmem:[#allocation114_spill] sm:$0xff] %v4397_v11 }
 0x2b2   :  { %2502 = vrot.lane.b32.xlu1 %v1310_v61, %s3253_s23  ;;  %v1336_v61 = vsel %vm169_vm0, %v1328_v38, %v1335_v18  ;;  %v1347_v38 = vrot.slane %v1322_v58, 4 }
 0x2b3   :  { %2246 = vrot.lane.b32.xlu2 %v892_v34, %s3251_s21  ;;  %v1332_v34 = vperm.slane %v1324_v48, %v3287_v8  ;;  %v4425_v7 = vperm.slane %v1336_v61, %v3291_v15  ;;  %v1380_v48 = vperm.slane %v3545_v36, %v3287_v8 }
 0x2b4   :  { %v4410_v11 = vpop.permute.xlu1 %2334 }
 0x2b5   :  { %v4414_v59 = vpop.permute.xlu2 %2114  ;;  %2506 = vrot.lane.b32.xlu0 %v4408_v52, %s3254_s24  ;;  %5548 = vst [vmem:[#allocation116_spill] sm:$0xff] %v4425_v7  ;;  %v1345_v29 = vrot.slane %v1332_v34, 4  ;;  %v1359_v18 = vrot.slane %v4425_v7, 4  ;;  %v1348_v57 = vsel %vm169_vm0, %v1332_v34, %v1347_v38  ;;  %v1375_v52 = vrot.slane %v3545_v36, 4 }
 0x2b7   :  { %v4420_v46 = vpop.permute.xlu0 %2338  ;;  %v1360_v61 = vsel %vm169_vm0, 0.0, %v1359_v18  ;;  %v1376_v36 = vsel %vm169_vm0, 0.0, %v1375_v52  ;;  %v1365_v18 = vrot.slane %v3595_v51, 4 }
 0x2ba   :  { %2514 = vrot.lane.b32.xlu1 %v1340_v53, %s3256_s26  ;;  %v941_v53 = vrot.slane %v3974_v6, 4  ;;  %v1370_v6 = vperm.slane %v3595_v51, %v3287_v8 }
 0x2bb   :  { %2258 = vrot.lane.b32.xlu2 %v3950_v23, %s3254_s24  ;;  %v1346_v23 = vsel %vm169_vm0, %v1345_v29, %v1322_v58  ;;  %v1356_v29 = vperm.slane %v1348_v57, %v3291_v15  ;;  %v1366_v57 = vsel %vm169_vm0, 0.0, %v1365_v18 }
 0x2bc   :  { %v4430_v60 = vpop.permute.xlu1 %2346  ;;  %v4450_v7 = vperm.slane %v1346_v23, %v3291_v15  ;;  %v1387_v52 = vrot.slane %v1370_v6, 4 }
 0x2bd   :  { %5549 = vst [vmem:[#allocation117_spill] sm:$0xff] %v4430_v60  ;;  %v4433_v5 = vpop.permute.xlu2 %2126  ;;  %2518 = vrot.lane.b32.xlu0 %v1358_v47, %s3257_s27  ;;  %v1385_v60 = vrot.slane %v1380_v48, 4  ;;  %v942_v47 = vsel %vm169_vm0, 0.0, %v941_v53  ;;  %v1363_v23 = vrot.slane %v1356_v29, 4 }
 0x2be   :  { %5550 = vst [vmem:[#allocation118_spill] sm:$0xff] %v4450_v7 }
 0x2bf   :  { %v4440_v33 = vpop.permute.xlu0 %2350  ;;  %v1386_v38 = vsel %vm169_vm0, %v1385_v60, %v1370_v6  ;;  %v1364_v51 = vsel %vm169_vm0, 0.0, %v1363_v23  ;;  %v1432_v6 = vperm.slane %v3572_v14, %v3287_v8 }
 0x2c2   :  { %2526 = vrot.lane.b32.xlu1 %v1360_v61, %s3262_s3  ;;  %v1384_v61 = vperm.slane %v1376_v36, %v3287_v8 }
 0x2c3   :  { %2270 = vrot.lane.b32.xlu2 %v942_v47, %s3257_s27  ;;  %v4468_v47 = vperm.slane %v1386_v38, %v3291_v15  ;;  %v1374_v38 = vperm.slane %v1366_v57, %v3287_v8 }
 0x2c4   :  { %v4454_v58 = vpop.permute.xlu1 %2358  ;;  %v1397_v60 = vrot.slane %v1384_v61, 4 }
 0x2c5   :  { %5551 = vst [vmem:[#allocation119_spill] sm:$0xff] %v4454_v58  ;;  %v4457_v34 = vpop.permute.xlu2 %2138  ;;  %2530 = vrot.lane.b32.xlu0 %v4450_v7, %s5405_s28  ;;  %v1409_v36 = vrot.slane %v4468_v47, 4  ;;  %v1399_v58 = vrot.slane %v1374_v38, 4 }
 0x2c6   :  { %5553 = vst [vmem:[#allocation121_spill] sm:$0xff] %v4468_v47 }
 0x2c7   :  { %v4464_v53 = vpop.permute.xlu0 %2362  ;;  %v1410_v23 = vsel %vm169_vm0, 0.0, %v1409_v36  ;;  %v1400_v36 = vsel %vm169_vm0, %v1384_v61, %v1399_v58 }
 0x2c8   :  { %5552 = vst [vmem:[#allocation120_spill] sm:$0xff] %v4464_v53 }
 0x2ca   :  { %2538 = vrot.lane.b32.xlu1 %v1356_v29, %s3260_s30  ;;  %v947_v29 = vrot.slane %v4017_v16, 4 }
 0x2cb   :  { %2282 = vrot.lane.b32.xlu2 %v3991_v31, %s5405_s28  ;;  %v1388_v31 = vsel %vm169_vm0, %v1380_v48, %v1387_v52  ;;  %s5555_s28 = smov 100   ;;  %v1437_v52 = vrot.slane %v1432_v6, 4 }
 0x2cc   :  { %v4474_v7 = vpop.permute.xlu1 %2370  ;;  %v4494_v16 = vperm.slane %v1388_v31, %v3291_v15  ;;  %v1427_v31 = vrot.slane %v3572_v14, 4 }
 0x2cd   :  { %5554 = vst [vmem:[#allocation122_spill] sm:$0xff] %v4474_v7  ;;  %v4477_v53 = vpop.permute.xlu2 %2150  ;;  %2542 = vrot.lane.b32.xlu0 %v1364_v51, %s3261_s2  ;;  %v1398_v7 = vsel %vm169_vm0, %v1397_v60, %v1374_v38  ;;  %v948_v51 = vsel %vm169_vm0, 0.0, %v947_v29  ;;  %v1422_v60 = vperm.slane %v3628_v62, %v3287_v8 }
 0x2ce   :  { %5556 = vst [vmem:[#allocation123_spill] sm:$0xff] %v4494_v16  ;;  %v1404_v48 = vperm.slane %v1398_v7, %v3291_v15  ;;  %v4511_v7 = vperm.slane %v1400_v36, %v3291_v15 }
 0x2cf   :  { %v4483_v18 = vpop.permute.xlu0 %2374 }
 0x2d0   :  { %v1413_v29 = vrot.slane %v1404_v48, 4  ;;  %5559 = vst [vmem:[#allocation126_spill] sm:$0xff] %v4511_v7 }
 0x2d2   :  { %2550 = vrot.lane.b32.xlu1 %v1410_v23, %s5555_s28  ;;  %v1438_v23 = vsel %vm169_vm0, %v1437_v52, %v1422_v60  ;;  %v1414_v61 = vsel %vm169_vm0, 0.0, %v1413_v29  ;;  %v1428_v52 = vsel %vm169_vm0, 0.0, %v1427_v31 }
 0x2d3   :  { %2294 = vrot.lane.b32.xlu2 %v948_v51, %s3261_s2  ;;  %v1417_v51 = vrot.slane %v3628_v62, 4  ;;  %v4522_v14 = vperm.slane %v1438_v23, %v3291_v15  ;;  %v1415_v62 = vrot.slane %v4511_v7, 4  ;;  %v1436_v23 = vperm.slane %v1428_v52, %v3287_v8 }
 0x2d4   :  { %v4496_v57 = vpop.permute.xlu1 %2382 }
 0x2d5   :  { %5557 = vst [vmem:[#allocation124_spill] sm:$0xff] %v4496_v57  ;;  %v4499_v47 = vpop.permute.xlu2 %2162  ;;  %2554 = vrot.lane.b32.xlu0 %v4494_v16, %s3266_s7  ;;  %v1439_v57 = vrot.slane %v1422_v60, 4  ;;  %v1021_v16 = vrot.slane %v4069_v50, 4  ;;  %v1418_v50 = vsel %vm169_vm0, 0.0, %v1417_v51  ;;  %v1461_v31 = vrot.slane %v4522_v14, 4 }
 0x2d6   :  { %5561 = vst [vmem:[#allocation128_spill] sm:$0xff] %v4522_v14 }
 0x2d7   :  { %v4506_v38 = vpop.permute.xlu0 %2386  ;;  %v1022_v60 = vsel %vm169_vm0, %v1021_v16, %v4053_v27  ;;  %v1449_v27 = vrot.slane %v1436_v23, 4 }
 0x2d8   :  { %5558 = vst [vmem:[#allocation125_spill] sm:$0xff] %v4506_v38 }
 0x2da   :  { %2562 = vrot.lane.b32.xlu1 %v1404_v48, %s3268_s9  ;;  %v997_v48 = vrot.slane %v4062_v49, 4 }
 0x2db   :  { %2306 = vrot.lane.b32.xlu2 %v4034_v17, %s3266_s7  ;;  %v1440_v17 = vsel %vm169_vm0, %v1432_v6, %v1439_v57  ;;  %v4546_v6 = vperm.slane %v1022_v60, %v3291_v15  ;;  %v1462_v57 = vsel %vm169_vm0, 0.0, %v1461_v31 }
 0x2dc   :  { %v4518_v58 = vpop.permute.xlu1 %2394  ;;  %v4541_v7 = vperm.slane %v1440_v17, %v3291_v15  ;;  %v998_v49 = vsel %vm169_vm0, 0.0, %v997_v48 }
 0x2dd   :  { %5560 = vst [vmem:[#allocation127_spill] sm:$0xff] %v4518_v58  ;;  %v4525_v36 = vpop.permute.xlu2 %2174  ;;  %2566 = vrot.lane.b32.xlu0 %v1414_v61, %s3269_s10  ;;  %v1426_v58 = vperm.slane %v1418_v50, %v3287_v8  ;;  %v1416_v61 = vsel %vm169_vm0, 0.0, %v1415_v62  ;;  %v5565_v50 = vld [vmem:[#allocation25_spill] sm:$0xff]  ;;  %v1045_v17 = vrot.slane %v4546_v6, 4 }
 0x2de   :  { %5563 = vst [vmem:[#allocation130_spill] sm:$0xff] %v4541_v7  ;;  %v1463_v62 = vrot.slane %v4541_v7, 4  ;;  %v1484_v48 = vperm.slane %v5565_v50, %v3287_v8  ;;  %v1479_v14 = vrot.slane %v5565_v50, 4 }
 0x2df   :  { %v4534_v29 = vpop.permute.xlu0 %2398  ;;  %v1451_v51 = vrot.slane %v1426_v58, 4 }
 0x2e0   :  { %5562 = vst [vmem:[#allocation129_spill] sm:$0xff] %v4534_v29 }
 0x2e1   :  { %v1452_v31 = vsel %vm169_vm0, %v1436_v23, %v1451_v51  ;;  %v1480_v51 = vsel %vm169_vm0, 0.0, %v1479_v14 }
 0x2e2   :  { %2574 = vrot.lane.b32.xlu1 %v1416_v61, %s3271_s11  ;;  %v1450_v61 = vsel %vm169_vm0, %v1449_v27, %v1426_v58  ;;  %v1460_v27 = vperm.slane %v1452_v31, %v3291_v15 }
 0x2e3   :  { %2318 = vrot.lane.b32.xlu2 %v998_v49, %s3269_s10  ;;  %v1464_v49 = vsel %vm169_vm0, 0.0, %v1463_v62  ;;  %v4569_v7 = vperm.slane %v1450_v61, %v3291_v15 }
 0x2e4   :  { %v4549_v16 = vpop.permute.xlu1 %2406  ;;  %v1467_v61 = vrot.slane %v1460_v27, 4 }
 0x2e5   :  { %5564 = vst [vmem:[#allocation131_spill] sm:$0xff] %v4549_v16  ;;  %v4552_v52 = vpop.permute.xlu2 %2186  ;;  %2578 = vrot.lane.b32.xlu0 %v1462_v57, %s3242_s0  ;;  %v1489_v16 = vrot.slane %v1484_v48, 4  ;;  %v1046_v57 = vsel %vm169_vm0, 0.0, %v1045_v17 }
 0x2e6   :  { %5567 = vst [vmem:[#allocation132_spill] sm:$0xff] %v4569_v7 }
 0x2e7   :  { %v4559_v60 = vpop.permute.xlu0 %2410 }
 0x2e8   :  { %5566 = vst [vmem:[#allocation25_spill] sm:$0xff] %v4559_v60  ;;  %v5568_v60 = vld [vmem:[#allocation31_spill] sm:$0xff] }
 0x2e9   :  { %v1474_v29 = vperm.slane %v5568_v60, %v3287_v8  ;;  %v1469_v50 = vrot.slane %v5568_v60, 4 }
 0x2ea   :  { %2586 = vrot.lane.b32.xlu1 %v1464_v49, %s3243_s13  ;;  %v1488_v49 = vperm.slane %v1480_v51, %v3287_v8 }
 0x2eb   :  { %2330 = vrot.lane.b32.xlu2 %v1046_v57, %s3242_s0  ;;  %v1490_v62 = vsel %vm169_vm0, %v1489_v16, %v1474_v29  ;;  %v1470_v31 = vsel %vm169_vm0, 0.0, %v1469_v50  ;;  %v1491_v14 = vrot.slane %v1474_v29, 4  ;;  %v1468_v16 = vsel %vm169_vm0, 0.0, %v1467_v61 }
 0x2ec   :  { %v4573_v58 = vpop.permute.xlu1 %2418  ;;  %v4587_v57 = vperm.slane %v1490_v62, %v3291_v15  ;;  %v1501_v60 = vrot.slane %v1488_v49, 4  ;;  %v1478_v62 = vperm.slane %v1470_v31, %v3287_v8 }
 0x2ed   :  { %5569 = vst [vmem:[#allocation31_spill] sm:$0xff] %v4573_v58  ;;  %v4576_v23 = vpop.permute.xlu2 %2198  ;;  %2590 = vrot.lane.b32.xlu0 %v4569_v7, %s3244_s14  ;;  %v5574_v58 = vld [vmem:[#allocation8_spill] sm:$0xff] }
 0x2ee   :  { %5571 = vst [vmem:[#allocation134_spill] sm:$0xff] %v4587_v57  ;;  %v1513_v51 = vrot.slane %v4587_v57, 4  ;;  %v1502_v61 = vsel %vm169_vm0, %v1501_v60, %v1478_v62  ;;  %v1503_v38 = vrot.slane %v1478_v62, 4  ;;  %v5575_v57 = vld [vmem:[#allocation26_spill] sm:$0xff] }
 0x2ef   :  { %v4583_v17 = vpop.permute.xlu0 %2422  ;;  %v2918_v31 = vsel %vm5436_vm1, %v5575_v57, %v3955_v41  ;;  %v1508_v41 = vperm.slane %v1502_v61, %v3291_v15  ;;  %v5576_v57 = vld [vmem:[#allocation9_spill] sm:$0xff]  ;;  %v5579_v61 = vld [vmem:[#allocation28_spill] sm:$0xff] }
 0x2f0   :  { %5570 = vst [vmem:[#allocation133_spill] sm:$0xff] %v4583_v17  ;;  %v1514_v29 = vsel %vm169_vm0, 0.0, %v1513_v51 }
 0x2f2   :  { %2598 = vrot.lane.b32.xlu1 %v1460_v27, %s3245_s15  ;;  %v1051_v27 = vrot.slane %v4127_v30, 4 }
 0x2f3   :  { %2342 = vrot.lane.b32.xlu2 %v4101_v25, %s3244_s14  ;;  %v1492_v25 = vsel %vm169_vm0, %v1484_v48, %v1491_v14  ;;  %v2919_v48 = vsel %vm5435_vm2, %v2918_v31, %v3964_v28  ;;  %v5577_v28 = vld [vmem:[#allocation11_spill] sm:$0xff]  ;;  %v1531_v31 = vrot.slane %v5579_v61, 4 }
 0x2f4   :  { %v4593_v7 = vpop.permute.xlu1 %2430  ;;  %v1052_v30 = vsel %vm169_vm0, 0.0, %v1051_v27  ;;  %v4617_v14 = vperm.slane %v1492_v25, %v3291_v15  ;;  %v2949_v27 = vsel %vm5436_vm1, %v3841_v22, %v4183_v10  ;;  %v5578_v25 = vld [vmem:[#allocation12_spill] sm:$0xff]  ;;  %v1536_v22 = vperm.slane %v5579_v61, %v3287_v8 }
 0x2f5   :  { %5572 = vst [vmem:[#allocation135_spill] sm:$0xff] %v4593_v7  ;;  %v2211_v17 = vpop.permute.xlu2 %2210  ;;  %2602 = vrot.lane.b32.xlu0 %v1468_v16, %s3247_s17  ;;  %v5573_v7 = vld [vmem:[#allocation10_spill] sm:$0xff]  ;;  %v1517_v10 = vrot.slane %v1508_v41, 4 }
 0x2f6   :  { %v2826_v16 = vsel %vm5436_vm1, %v5574_v58, %v5573_v7  ;;  %v2920_v7 = vsel %vm2829_vm3, %v2919_v48, %v4372_v12  ;;  %v1504_v12 = vsel %vm169_vm0, %v1488_v49, %v1503_v38  ;;  %v5581_v38 = vld [vmem:[#allocation34_spill] sm:$0xff] }
 0x2f7   :  { %v4600_v50 = vpop.permute.xlu0 %2434  ;;  %v2828_v60 = vsel %vm5435_vm2, %v2826_v16, %v5576_v57  ;;  %v2921_v16 = vsel %vm2831_vm4, %v2920_v7, %v3977_v1  ;;  %v5580_v57 = vld [vmem:[#allocation14_spill] sm:$0xff]  ;;  %v1526_v49 = vperm.slane %v5581_v38, %v3287_v8  ;;  %v5582_v7 = vld [vmem:[#allocation13_spill] sm:$0xff] }
 0x2f8   :  { %v2830_v62 = vsel %vm2829_vm3, %v2828_v60, %v5577_v28  ;;  %v4649_v28 = vperm.slane %v1504_v12, %v3291_v15  ;;  %v2922_v1 = vsel %vm2833_vm5, %v2921_v16, %v3986_v55  ;;  %v1521_v55 = vrot.slane %v5581_v38, 4 }
 0x2f9   :  { %v2923_v12 = vsel %vm5415_vm6, %v2922_v1, %v4390_v13  ;;  %v1543_v16 = vrot.slane %v1526_v49, 4  ;;  %v1101_v38 = vrot.slane %v4169_v3, 4  ;;  %v5585_v1 = vld [vmem:[#allocation16_spill] sm:$0xff] }
 0x2fa   :  { %2610 = vrot.lane.b32.xlu1 %v1514_v29, %s3250_s20  ;;  %v2832_v29 = vsel %vm2831_vm4, %v2830_v62, %v5578_v25  ;;  %v1541_v25 = vrot.slane %v1536_v22, 4  ;;  %v1519_v13 = vrot.slane %v4649_v28, 4  ;;  %v5587_v3 = vld [vmem:[#allocation72_spill] sm:$0xff] }
 0x2fb   :  { %2354 = vrot.lane.b32.xlu2 %v1052_v30, %s3247_s17  ;;  %v2950_v30 = vsel %vm5435_vm2, %v2949_v27, %v2211_v17  ;;  %v2834_v60 = vsel %vm2833_vm5, %v2832_v29, %v5580_v57  ;;  %v1532_v27 = vsel %vm169_vm0, 0.0, %v1531_v31  ;;  %v5584_v57 = vld [vmem:[#allocation70_spill] sm:$0xff] }
 0x2fc   :  { %v4621_v58 = vpop.permute.xlu1 %2442  ;;  %v2951_v17 = vsel %vm2829_vm3, %v2950_v30, %v4193_v35  ;;  %v2836_v62 = vsel %vm5415_vm6, %v2834_v60, %v5582_v7  ;;  %v1518_v35 = vsel %vm169_vm0, 0.0, %v1517_v10  ;;  %v2924_v60 = vsel %vm5414_vm7, %v2923_v12, %v5584_v57  ;;  %v5588_v57 = vld [vmem:[#allocation63_spill] sm:$0xff] }
 0x2fd   :  { %v2223_v51 = vpop.permute.xlu2 %2222  ;;  %2614 = vrot.lane.b32.xlu0 %v4617_v14, %s3249_s19  ;;  %v2952_v31 = vsel %vm2831_vm4, %v2951_v17, %v4202_v26  ;;  %v1542_v12 = vsel %vm169_vm0, %v1541_v25, %v1526_v49  ;;  %v1102_v25 = vsel %vm169_vm0, 0.0, %v1101_v38 }
 0x2fe   :  { %v2953_v10 = vsel %vm2833_vm5, %v2952_v31, %v2223_v51  ;;  %v1520_v31 = vsel %vm169_vm0, 0.0, %v1519_v13  ;;  %v5591_v13 = vld [vmem:[#allocation66_spill] sm:$0xff] }
 0x2ff   :  { %v4640_v48 = vpop.permute.xlu0 %2446 }
 0x302   :  { %2622 = vrot.lane.b32.xlu1 %v1508_v41, %s3252_s22  ;;  %v5583_v41 = vld [vmem:[#allocation15_spill] sm:$0xff] }
 0x303   :  { %2366 = vrot.lane.b32.xlu2 %v4144_v54, %s3249_s19  ;;  %v2838_v61 = vsel %vm5414_vm7, %v2836_v62, %v5583_v41  ;;  %v4672_v54 = vperm.slane %v1532_v27, %v3287_v8  ;;  %v5586_v62 = vld [vmem:[#allocation18_spill] sm:$0xff]  ;;  %v2925_v41 = vsel %vm2839_vm8, %v2924_v60, %v5587_v3  ;;  %v5590_v60 = vld [vmem:[#allocation17_spill] sm:$0xff] }
 0x304   :  { %v2455_v29 = vpop.permute.xlu1 %2454  ;;  %v2840_v7 = vsel %vm2839_vm8, %v2838_v61, %v5585_v1  ;;  %v2954_v61 = vsel %vm5415_vm6, %v2953_v10, %v4213_v39  ;;  %v5589_v1 = vld [vmem:[#allocation29_spill] sm:$0xff]  ;;  %v2926_v49 = vsel %vm2841_vm9, %v2925_v41, %v4414_v59 }
 0x305   :  { %v2235_v30 = vpop.permute.xlu2 %2234  ;;  %2626 = vrot.lane.b32.xlu0 %v1518_v35, %s3253_s23  ;;  %v3011_v26 = vsel %vm5436_vm1, %v4296_v40, %v2455_v29  ;;  %v2842_v27 = vsel %vm2841_vm9, %v2840_v7, %v5586_v62  ;;  %v1522_v35 = vsel %vm169_vm0, 0.0, %v1521_v55  ;;  %v1544_v40 = vsel %vm169_vm0, %v1536_v22, %v1543_v16  ;;  %v5592_v7 = vld [vmem:[#allocation68_spill] sm:$0xff] }
 0x306   :  { %v1553_v29 = vrot.slane %v4672_v54, 4  ;;  %v2887_v55 = vsel %vm5436_vm1, %v5589_v1, %v5588_v57  ;;  %v2844_v39 = vsel %vm2843_vm10, %v2842_v27, %v5590_v60  ;;  %v4709_v16 = vperm.slane %v1542_v12, %v3291_v15  ;;  %v5594_v27 = vld [vmem:[#allocation69_spill] sm:$0xff] }
 0x307   :  { %v2459_v17 = vpop.permute.xlu0 %2458  ;;  %v2888_v22 = vsel %vm5435_vm2, %v2887_v55, %v5591_v13  ;;  %v1530_v10 = vperm.slane %v1522_v35, %v3287_v8  ;;  %v2955_v38 = vsel %vm5414_vm7, %v2954_v61, %v4222_v44  ;;  %v2927_v12 = vsel %vm2843_vm10, %v2926_v49, %v4019_v21  ;;  %v5596_v61 = vld [vmem:[#allocation71_spill] sm:$0xff]  ;;  %v5597_v1 = vld [vmem:[#allocation21_spill] sm:$0xff] }
 0x308   :  { %v4687_v51 = vsel %vm5435_vm2, %v3011_v26, %v2459_v17  ;;  %v2889_v59 = vsel %vm2829_vm3, %v2888_v22, %v5592_v7  ;;  %v1552_v26 = vperm.slane %v1544_v40, %v3291_v15  ;;  %v5593_v17 = vld [vmem:[#allocation19_spill] sm:$0xff]  ;;  %v2956_v41 = vsel %vm2839_vm8, %v2955_v38, %v2235_v30  ;;  %v5598_v49 = vld [vmem:[#allocation73_spill] sm:$0xff] }
 0x309   :  { %v2846_v62 = vsel %vm5416_vm11, %v2844_v39, %v5593_v17  ;;  %v2890_v3 = vsel %vm2831_vm4, %v2889_v59, %v5594_v27  ;;  %v1554_v57 = vsel %vm169_vm0, %v1553_v29, %v1530_v10  ;;  %v2957_v60 = vsel %vm2841_vm9, %v2956_v41, %v4235_v24  ;;  %v5599_v29 = vld [vmem:[#allocation32_spill] sm:$0xff]  ;;  %v5600_v22 = vld [vmem:[#allocation77_spill] sm:$0xff] }
 0x30a   :  { %2634 = vrot.lane.b32.xlu1 %v1520_v31, %s3255_s25  ;;  %v5595_v31 = vld [vmem:[#allocation20_spill] sm:$0xff]  ;;  %v2891_v40 = vsel %vm2833_vm5, %v2890_v3, %v5596_v61  ;;  %v1567_v39 = vrot.slane %v1552_v26, 4  ;;  %v1588_v13 = vperm.slane %v5599_v29, %v3287_v8  ;;  %v1555_v3 = vrot.slane %v1530_v10, 4 }
 0x30b   :  { %2378 = vrot.lane.b32.xlu2 %v1102_v25, %s3253_s23  ;;  %v2848_v44 = vsel %vm5417_vm12, %v2846_v62, %v5595_v31  ;;  %v2892_v21 = vsel %vm5415_vm6, %v2891_v40, %v4023_v32  ;;  %v2928_v25 = vsel %vm5416_vm11, %v2927_v12, %v5598_v49  ;;  %v4748_v32 = vperm.slane %v1554_v57, %v3291_v15  ;;  %v5602_v17 = vld [vmem:[#allocation80_spill] sm:$0xff]  ;;  %v5603_v62 = vld [vmem:[#allocation23_spill] sm:$0xff]  ;;  %v5605_v31 = vld [vmem:[#allocation93_spill] sm:$0xff] }
 0x30c   :  { %v2850_v55 = vsel %vm5418_vm13, %v2848_v44, %v5597_v1  ;;  %v2893_v30 = vsel %vm5414_vm7, %v2892_v21, %v4042_v63  ;;  %v2929_v59 = vsel %vm5417_vm12, %v2928_v25, %v4433_v5  ;;  %v5601_v63 = vld [vmem:[#allocation22_spill] sm:$0xff]  ;;  %vm5438_vm7 = vcmask 523264   ;;  %v5604_v12 = vld [vmem:[#allocation83_spill] sm:$0xff] }
 0x30d   :  { %v2247_v35 = vpop.permute.xlu2 %2246  ;;  %2638 = vrot.lane.b32.xlu0 %v4709_v16, %s3256_s26  ;;  %v2894_v7 = vsel %vm2839_vm8, %v2893_v30, %v5600_v22  ;;  %v2852_v38 = vsel %vm5419_vm14, %v2850_v55, %v5601_v63  ;;  %vm5421_vm6 = vcmask 556032   ;;  %v2958_v41 = vsel %vm2843_vm10, %v2957_v60, %v4245_v4  ;;  %v5606_v44 = vld [vmem:[#allocation86_spill] sm:$0xff]  ;;  %v5609_v30 = vld [vmem:[#allocation89_spill] sm:$0xff]  ;;  %v5610_v60 = vld [vmem:[#allocation24_spill] sm:$0xff] }
 0x30e   :  { %v2895_v24 = vsel %vm2841_vm9, %v2894_v7, %v5602_v17  ;;  %v2854_v27 = vsel %vm5420_vm15, %v2852_v38, %v5603_v62  ;;  %v5607_v40 = vld [vmem:[#allocation74_spill] sm:$0xff]  ;;  %v1568_v1 = vsel %vm169_vm0, 0.0, %v1567_v39  ;;  %v1593_v10 = vrot.slane %v1588_v13, 4 }
 0x30f   :  { %v2896_v5 = vsel %vm2843_vm10, %v2895_v24, %v5604_v12  ;;  %v2930_v57 = vsel %vm5418_vm13, %v2929_v59, %v5607_v40  ;;  %v5608_v55 = vld [vmem:[#allocation38_spill] sm:$0xff]  ;;  %v1569_v25 = vrot.slane %v4748_v32, 4  ;;  %v2856_v22 = vsel %vm5438_vm7, %v2854_v27, %v5610_v60  ;;  %v5612_v59 = vld [vmem:[#allocation95_spill] sm:$0xff] }
 0x310   :  { %v2897_v61 = vsel %vm5416_vm11, %v2896_v5, %v5606_v44  ;;  %v1578_v21 = vperm.slane %v5608_v55, %v3287_v8  ;;  %v1583_v7 = vrot.slane %v5599_v29, 4  ;;  %v1151_v63 = vrot.slane %v5612_v59, 4  ;;  %v5613_v38 = vld [vmem:[#allocation94_spill] sm:$0xff]  ;;  %v5614_v24 = vld [vmem:[#allocation75_spill] sm:$0xff] }
 0x311   :  { %v2898_v4 = vsel %vm5417_vm12, %v2897_v61, %v5609_v30  ;;  %v2931_v62 = vsel %vm5419_vm14, %v2930_v57, %v5614_v24  ;;  %v5615_v5 = vld [vmem:[#allocation27_spill] sm:$0xff]  ;;  %v1556_v44 = vsel %vm169_vm0, %v4672_v54, %v1555_v3  ;;  %v1573_v61 = vrot.slane %v5608_v55, 4  ;;  %v5619_v3 = vld [vmem:[#allocation76_spill] sm:$0xff]  ;;  %v5621_v59 = vld [vmem:[#allocation78_spill] sm:$0xff] }
 0x312   :  { %2646 = vrot.lane.b32.xlu1 %v1552_v26, %s3265_s6  ;;  %v2959_v26 = vsel %vm5416_vm11, %v2958_v41, %v2247_v35  ;;  %v5611_v35 = vld [vmem:[#allocation92_spill] sm:$0xff]  ;;  %vm5422_vm11 = vcmask 588800   ;;  %v2858_v27 = vsel %vm5421_vm6, %v2856_v22, %v5615_v5  ;;  %v1594_v40 = vsel %vm169_vm0, %v1593_v10, %v1578_v21  ;;  %v5623_v24 = vld [vmem:[#allocation53_spill] sm:$0xff] }
 0x313   :  { %2390 = vrot.lane.b32.xlu2 %v5605_v31, %s3256_s26  ;;  %v2899_v39 = vsel %vm5418_vm13, %v2898_v4, %v5611_v35  ;;  %v2960_v12 = vsel %vm5417_vm12, %v2959_v26, %v4258_v19  ;;  %v5616_v41 = vld [vmem:[#allocation96_spill] sm:$0xff]  ;;  %v2932_v31 = vsel %vm5420_vm15, %v2931_v62, %v4457_v34  ;;  %v1595_v57 = vrot.slane %v1578_v21, 4  ;;  %v5617_v19 = vld [vmem:[#allocation55_spill] sm:$0xff]  ;;  %v5618_v4 = vld [vmem:[#allocation50_spill] sm:$0xff] }
 0x314   :  { %v2900_v17 = vsel %vm5419_vm14, %v2899_v39, %v5613_v38  ;;  %vm5426_vm12 = vcmask 621568   ;;  %v2860_v26 = vsel %vm5422_vm11, %v2858_v27, %v5617_v19  ;;  %v2961_v30 = vsel %vm5418_vm13, %v2960_v12, %v4268_v2  ;;  %v5622_v38 = vld [vmem:[#allocation101_spill] sm:$0xff]  ;;  %v5624_v27 = vld [vmem:[#allocation99_spill] sm:$0xff] }
 0x315   :  { %v2259_v49 = vpop.permute.xlu2 %2258  ;;  %2650 = vrot.lane.b32.xlu0 %v1568_v1, %s3262_s3  ;;  %v2901_v29 = vsel %vm5420_vm15, %v2900_v17, %v5616_v41  ;;  %v1570_v1 = vsel %vm169_vm0, 0.0, %v1569_v25  ;;  %v1152_v34 = vsel %vm169_vm0, 0.0, %v1151_v63  ;;  %v2933_v10 = vsel %vm5438_vm7, %v2932_v31, %v5619_v3  ;;  %v5625_v31 = vld [vmem:[#allocation30_spill] sm:$0xff]  ;;  %v5630_v3 = vld [vmem:[#allocation81_spill] sm:$0xff] }
 0x316   :  { %v2902_v54 = vsel %vm5438_vm7, %v2901_v29, %v5618_v4  ;;  %v2962_v55 = vsel %vm5419_vm14, %v2961_v30, %v2259_v49  ;;  %v4811_v21 = vperm.slane %v1556_v44, %v3291_v15  ;;  %v1600_v25 = vperm.slane %v1594_v40, %v3291_v15  ;;  %v5620_v49 = vld [vmem:[#allocation48_spill] sm:$0xff]  ;;  %v5626_v40 = vld [vmem:[#allocation79_spill] sm:$0xff] }
 0x317   :  { %v2903_v2 = vsel %vm5421_vm6, %v2902_v54, %v4239_v37  ;;  %v1584_v60 = vsel %vm169_vm0, 0.0, %v1583_v7  ;;  %v1574_v22 = vsel %vm169_vm0, 0.0, %v1573_v61  ;;  %vm5423_vm13 = vcmask 654336  }
 0x318   :  { %v2862_v39 = vsel %vm5426_vm12, %v2860_v26, %v5620_v49  ;;  %v2934_v63 = vsel %vm5421_vm6, %v2933_v10, %v5621_v59  ;;  %v2963_v37 = vsel %vm5420_vm15, %v2962_v55, %v5622_v38  ;;  %v1596_v17 = vsel %vm169_vm0, %v1588_v13, %v1595_v57  ;;  %v5628_v26 = vld [vmem:[#allocation97_spill] sm:$0xff]  ;;  %v5632_v49 = vld [vmem:[#allocation98_spill] sm:$0xff]  ;;  %v5633_v59 = vld [vmem:[#allocation35_spill] sm:$0xff] }
 0x319   :  { %v2904_v7 = vsel %vm5422_vm11, %v2903_v2, %v5623_v24  ;;  %v2935_v62 = vsel %vm5422_vm11, %v2934_v63, %v4477_v53  ;;  %v1592_v12 = vperm.slane %v1584_v60, %v3287_v8  ;;  %v1582_v5 = vperm.slane %v1574_v22, %v3287_v8  ;;  %v5631_v60 = vld [vmem:[#allocation58_spill] sm:$0xff]  ;;  %v5634_v38 = vld [vmem:[#allocation36_spill] sm:$0xff]  ;;  %v5636_v24 = vld [vmem:[#allocation41_spill] sm:$0xff] }
 0x31a   :  { %2658 = vrot.lane.b32.xlu1 %v1570_v1, %s3259_s29  ;;  %v2905_v41 = vsel %vm5426_vm12, %v2904_v7, %v5624_v27  ;;  %v1617_v29 = vrot.slane %v1600_v25, 4  ;;  %vm5424_vm14 = vcmask 687104   ;;  %v2864_v44 = vsel %vm5423_vm13, %v2862_v39, %v5625_v31  ;;  %v5627_v1 = vld [vmem:[#allocation56_spill] sm:$0xff]  ;;  %v5637_v27 = vld [vmem:[#allocation82_spill] sm:$0xff] }
 0x31b   :  { %2402 = vrot.lane.b32.xlu2 %v1152_v34, %s3262_s3  ;;  %v2964_v13 = vsel %vm5438_vm7, %v2963_v37, %v4290_v45  ;;  %v4840_v61 = vperm.slane %v1596_v17, %v3291_v15  ;;  %v2936_v53 = vsel %vm5426_vm12, %v2935_v62, %v5626_v40  ;;  %v2906_v19 = vsel %vm5423_vm13, %v2905_v41, %v5627_v1  ;;  %v5629_v34 = vld [vmem:[#allocation33_spill] sm:$0xff] }
 0x31c   :  { %v1605_v30 = vrot.slane %v1592_v12, 4  ;;  %vm5425_vm15 = vcmask 719872   ;;  %v2866_v45 = vsel %vm5424_vm14, %v2864_v44, %v5629_v34  ;;  %v1618_v4 = vsel %vm169_vm0, 0.0, %v1617_v29 }
 0x31d   :  { %v2271_v35 = vpop.permute.xlu2 %2270  ;;  %2662 = vrot.lane.b32.xlu0 %v4811_v21, %s3260_s30  ;;  %v1607_v54 = vrot.slane %v1582_v5, 4  ;;  %v2937_v10 = vsel %vm5423_vm13, %v2936_v53, %v5630_v3  ;;  %v2907_v22 = vsel %vm5424_vm14, %v2906_v19, %v5631_v60  ;;  %v1201_v39 = vrot.slane %v5632_v49, 4  ;;  %v5639_v53 = vld [vmem:[#allocation59_spill] sm:$0xff] }
 0x31e   :  { %v2965_v57 = vsel %vm5421_vm6, %v2964_v13, %v2271_v35  ;;  %v2938_v35 = vsel %vm5424_vm14, %v2937_v10, %v4499_v47  ;;  %v1635_v63 = vrot.slane %v5633_v59, 4  ;;  %vm2869_vm6 = vcmask 752640   ;;  %v5638_v13 = vld [vmem:[#allocation37_spill] sm:$0xff]  ;;  %v5644_v49 = vld [vmem:[#allocation107_spill] sm:$0xff] }
 0x31f   :  { %v2966_v55 = vsel %vm5422_vm11, %v2965_v57, %v4305_v9  ;;  %v2868_v37 = vsel %vm5425_vm15, %v2866_v45, %v5634_v38  ;;  %v5635_v9 = vld [vmem:[#allocation102_spill] sm:$0xff]  ;;  %v4871_v7 = vperm.slane %v5636_v24, %v3287_v8  ;;  %v1606_v47 = vsel %vm169_vm0, %v1605_v30, %v1582_v5  ;;  %v5640_v30 = vld [vmem:[#allocation84_spill] sm:$0xff]  ;;  %v5642_v10 = vld [vmem:[#allocation61_spill] sm:$0xff] }
 0x320   :  { %v2908_v17 = vsel %vm5425_vm15, %v2907_v22, %v5635_v9  ;;  %v2967_v62 = vsel %vm5426_vm12, %v2966_v55, %v4313_v56  ;;  %v2939_v41 = vsel %vm5425_vm15, %v2938_v35, %v5637_v27  ;;  %v1608_v44 = vsel %vm169_vm0, %v1592_v12, %v1607_v54  ;;  %v5641_v54 = vld [vmem:[#allocation40_spill] sm:$0xff] }
 0x321   :  { %v2870_v40 = vsel %vm2869_vm6, %v2868_v37, %v5638_v13  ;;  %vm5427_vm11 = vcmask 785408   ;;  %v2909_v57 = vsel %vm2869_vm6, %v2908_v17, %v5639_v53  ;;  %v1202_v56 = vsel %vm169_vm0, 0.0, %v1201_v39  ;;  %v5647_v17 = vld [vmem:[#allocation62_spill] sm:$0xff]  ;;  %v5650_v13 = vld [vmem:[#allocation109_spill] sm:$0xff]  ;;  %v5651_v53 = vld [vmem:[#allocation100_spill] sm:$0xff] }
 0x322   :  { %2670 = vrot.lane.b32.xlu1 %v1600_v25, %s3263_s4  ;;  %v1619_v25 = vrot.slane %v4840_v61, 4  ;;  %v1636_v5 = vsel %vm169_vm0, 0.0, %v1635_v63  ;;  %v4890_v1 = vperm.slane %v5633_v59, %v3287_v8  ;;  %v1625_v19 = vrot.slane %v5636_v24, 4  ;;  %v5645_v59 = vld [vmem:[#allocation43_spill] sm:$0xff] }
 0x323   :  { %2414 = vrot.lane.b32.xlu2 %v5628_v26, %s3260_s30  ;;  %v4895_v12 = vperm.slane %v1606_v47, %v3291_v15  ;;  %v1647_v26 = vrot.slane %v4871_v7, 4  ;;  %v2940_v34 = vsel %vm2869_vm6, %v2939_v41, %v5640_v30  ;;  %v2872_v3 = vsel %vm5427_vm11, %v2870_v40, %v5641_v54  ;;  %v5648_v41 = vld [vmem:[#allocation46_spill] sm:$0xff] }
 0x324   :  { %v1620_v31 = vsel %vm169_vm0, 0.0, %v1619_v25  ;;  %v2910_v55 = vsel %vm5427_vm11, %v2909_v57, %v5642_v10  ;;  %v4912_v60 = vperm.slane %v1636_v5, %v3287_v8  ;;  %v1626_v35 = vsel %vm169_vm0, 0.0, %v1625_v19  ;;  %v5652_v57 = vld [vmem:[#allocation64_spill] sm:$0xff]  ;;  %v5653_v30 = vld [vmem:[#allocation106_spill] sm:$0xff]  ;;  %v5655_v10 = vld [vmem:[#allocation103_spill] sm:$0xff] }
 0x325   :  { %v2283_v2 = vpop.permute.xlu2 %2282  ;;  %2674 = vrot.lane.b32.xlu0 %v1618_v4, %s5555_s28  ;;  %v1616_v4 = vperm.slane %v1608_v44, %v3291_v15  ;;  %v1634_v27 = vperm.slane %v1626_v35, %v3287_v8  ;;  %vm5430_vm12 = vcmask 916480  }
 0x326   :  { %v2968_v29 = vsel %vm5423_vm13, %v2967_v62, %v2283_v2  ;;  %vm5428_vm13 = vcmask 818176   ;;  %v2941_v2 = vsel %vm5427_vm11, %v2940_v34, %v4525_v36  ;;  %v5646_v36 = vld [vmem:[#allocation85_spill] sm:$0xff]  ;;  %v1648_v62 = vsel %vm169_vm0, %v4890_v1, %v1647_v26 }
 0x327   :  { %v2969_v45 = vsel %vm5424_vm14, %v2968_v29, %v4324_v43  ;;  %v5643_v43 = vld [vmem:[#allocation104_spill] sm:$0xff]  ;;  %vm5429_vm14 = vcmask 850944   ;;  %v2874_v63 = vsel %vm5428_vm13, %v2872_v3, %v5645_v59  ;;  %v2942_v38 = vsel %vm5428_vm13, %v2941_v2, %v5646_v36  ;;  %v5656_v2 = vld [vmem:[#allocation39_spill] sm:$0xff] }
 0x328   :  { %v2911_v22 = vsel %vm5428_vm13, %v2910_v55, %v5643_v43  ;;  %v2970_v39 = vsel %vm5425_vm15, %v2969_v45, %v5644_v49  ;;  %v1623_v9 = vrot.slane %v1616_v4, 4  ;;  %v1657_v47 = vrot.slane %v4912_v60, 4  ;;  %v5657_v43 = vld [vmem:[#allocation88_spill] sm:$0xff]  ;;  %v5658_v49 = vld [vmem:[#allocation65_spill] sm:$0xff] }
 0x329   :  { %v2912_v24 = vsel %vm5429_vm14, %v2911_v22, %v5647_v17  ;;  %vm5431_vm15 = vcmask 883712   ;;  %v2876_v29 = vsel %vm5429_vm14, %v2874_v63, %v5648_v41  ;;  %v1656_v26 = vperm.slane %v1648_v62, %v3291_v15  ;;  %v5659_v63 = vld [vmem:[#allocation51_spill] sm:$0xff] }
 0x32a   :  { %2682 = vrot.lane.b32.xlu1 %v1620_v31, %s3267_s8  ;;  %v5649_v31 = vld [vmem:[#allocation87_spill] sm:$0xff]  ;;  %v1624_v19 = vsel %vm169_vm0, 0.0, %v1623_v9  ;;  %v1207_v55 = vrot.slane %v5655_v10, 4  ;;  %v5668_v10 = vld [vmem:[#allocation113_spill] sm:$0xff] }
 0x32b   :  { %2426 = vrot.lane.b32.xlu2 %v1202_v56, %s5555_s28  ;;  %v2943_v44 = vsel %vm5429_vm14, %v2942_v38, %v5649_v31  ;;  %v2913_v56 = vsel %vm5431_vm15, %v2912_v24, %v5652_v57  ;;  %v1671_v59 = vrot.slane %v1656_v26, 4  ;;  %v5660_v38 = vld [vmem:[#allocation90_spill] sm:$0xff]  ;;  %v5661_v62 = vld [vmem:[#allocation67_spill] sm:$0xff] }
 0x32c   :  { %v2944_v5 = vsel %vm5431_vm15, %v2943_v44, %v4552_v52  ;;  %v2914_v34 = vsel %vm5430_vm12, %v2913_v56, %v5653_v30  ;;  %v1658_v52 = vsel %vm169_vm0, %v1657_v47, %v1634_v27  ;;  %v1208_v17 = vsel %vm169_vm0, 0.0, %v1207_v55  ;;  %v5662_v31 = vld [vmem:[#allocation54_spill] sm:$0xff]  ;;  %v5664_v56 = vld [vmem:[#allocation111_spill] sm:$0xff]  ;;  %v5666_v30 = vld [vmem:[#allocation105_spill] sm:$0xff] }
 0x32d   :  { %v2295_v25 = vpop.permute.xlu2 %2294  ;;  %2686 = vrot.lane.b32.xlu0 %v4895_v12, %s3268_s9  ;;  %v2945_v22 = vsel %vm5430_vm12, %v2944_v5, %v5657_v43  ;;  %v4964_v36 = vperm.slane %v1658_v52, %v3291_v15  ;;  %v5669_v52 = vld [vmem:[#allocation114_spill] sm:$0xff] }
 0x32e   :  { %v2971_v37 = vsel %vm2869_vm6, %v2970_v39, %v2295_v25  ;;  %v1692_v25 = vperm.slane %v5656_v2, %v3287_v8 }
 0x32f   :  { %v2972_v40 = vsel %vm5427_vm11, %v2971_v37, %v5650_v13  ;;  %vm5432_vm11 = vcmask 949248   ;;  %v1672_v13 = vsel %vm169_vm0, 0.0, %v1671_v59 }
 0x330   :  { %v2973_v3 = vsel %vm5428_vm13, %v2972_v40, %v4356_v20  ;;  %v2915_v39 = vsel %vm5432_vm11, %v2914_v34, %v5658_v49  ;;  %vm2883_vm13 = vcmask 982016   ;;  %v2946_v37 = vsel %vm5432_vm11, %v2945_v22, %v5660_v38  ;;  %v5663_v40 = vld [vmem:[#allocation44_spill] sm:$0xff] }
 0x331   :  { %v1697_v24 = vrot.slane %v1692_v25, 4  ;;  %v2916_v47 = vsel %vm2883_vm13, %v2915_v39, %v5661_v62  ;;  %v2947_v41 = vsel %vm2883_vm13, %v2946_v37, %v4576_v23  ;;  %v1673_v23 = vrot.slane %v4964_v36, 4 }
 0x332   :  { %2694 = vrot.lane.b32.xlu1 %v1616_v4, %s5510_s5  ;;  %v5654_v4 = vld [vmem:[#allocation49_spill] sm:$0xff]  ;;  %v1255_v34 = vrot.slane %v5666_v30, 4  ;;  %v1677_v39 = vrot.slane %v5663_v40, 4 }
 0x333   :  { %2438 = vrot.lane.b32.xlu2 %v5651_v53, %s3268_s9  ;;  %v2878_v54 = vsel %vm5431_vm15, %v2876_v29, %v5654_v4  ;;  %v1659_v29 = vrot.slane %v1634_v27, 4  ;;  %v1682_v53 = vperm.slane %v5663_v40, %v3287_v8  ;;  %v1687_v27 = vrot.slane %v5656_v2, 4  ;;  %v5667_v4 = vld [vmem:[#allocation57_spill] sm:$0xff] }
 0x334   :  { %v2880_v20 = vsel %vm5430_vm12, %v2878_v54, %v5659_v63  ;;  %v1674_v49 = vsel %vm169_vm0, 0.0, %v1673_v23  ;;  %v5670_v63 = vld [vmem:[#allocation60_spill] sm:$0xff]  ;;  %v1256_v38 = vsel %vm169_vm0, 0.0, %v1255_v34 }
 0x335   :  { %v2307_v45 = vpop.permute.xlu2 %2306  ;;  %2698 = vrot.lane.b32.xlu0 %v1624_v19, %s3271_s11  ;;  %v2882_v44 = vsel %vm5432_vm11, %v2880_v20, %v5662_v31  ;;  %v5665_v19 = vld [vmem:[#allocation91_spill] sm:$0xff]  ;;  %v1660_v43 = vsel %vm169_vm0, %v4912_v60, %v1659_v29  ;;  %v1699_v59 = vrot.slane %v1682_v53, 4  ;;  %v1688_v62 = vsel %vm169_vm0, 0.0, %v1687_v27 }
 0x336   :  { %v2974_v35 = vsel %vm5429_vm14, %v2973_v3, %v2307_v45  ;;  %vm2885_vm14 = vcmask 1014784   ;;  %v1698_v45 = vsel %vm169_vm0, %v1697_v24, %v1682_v53  ;;  %v2884_v54 = vsel %vm2883_vm13, %v2882_v44, %v5667_v4 }
 0x337   :  { %v2975_v9 = vsel %vm5431_vm15, %v2974_v35, %v4369_v0  ;;  %v2917_v0 = vsel %vm2885_vm14, %v2916_v47, %v4350_v42  ;;  %vm5434_vm15 = vcmask 1045508   ;;  %v2886_v20 = vsel %vm2885_vm14, %v2884_v54, %v5670_v63 }
 0x338   :  { %v2976_v5 = vsel %vm5430_vm12, %v2975_v9, %v5664_v56  ;;  %v3112_v3 = vrot.slane %v2917_v0, 6  ;;  %vm5437_vm12 = vcmask 1041408   ;;  %v5011_v60 = vperm.slane %v1660_v43, %v3291_v15 }
 0x339   :  { %v1700_v29 = vsel %vm169_vm0, %v1692_v25, %v1699_v59  ;;  %v1696_v44 = vperm.slane %v1688_v62, %v3287_v8  ;;  %v5679_v62 = vld [vmem:[#allocation112_spill] sm:$0xff] }
 0x33a   :  { %2706 = vrot.lane.b32.xlu1 %v1656_v26, %s3239_s12  ;;  %v2948_v26 = vsel %vm2885_vm14, %v2947_v41, %v5665_v19  ;;  %v3119_v37 = vsel %vm5437_vm12, %v2886_v20, %v3112_v3  ;;  %v1678_v41 = vsel %vm169_vm0, 0.0, %v1677_v39  ;;  %v5026_v40 = vperm.slane %v1700_v29, %v3291_v15  ;;  %v5672_v19 = vld [vmem:[#allocation42_spill] sm:$0xff]  ;;  %v5674_v3 = vld [vmem:[#allocation117_spill] sm:$0xff] }
 0x33b   :  { %2450 = vrot.lane.b32.xlu2 %v1208_v17, %s3271_s11  ;;  %v3113_v22 = vrot.slane %v2948_v26, 4  ;;  %v1704_v17 = vperm.slane %v1698_v45, %v3291_v15  ;;  %v1709_v25 = vrot.slane %v1696_v44, 4  ;;  %v1739_v54 = vrot.slane %v5672_v19, 4 }
 0x33c   :  { %v1723_v27 = vrot.slane %v5026_v40, 4  ;;  %vm5715_vm12 = vcmask 916480  }
 0x33d   :  { %v2319_v57 = vpop.permute.xlu2 %2318  ;;  %2710 = vrot.lane.b32.xlu0 %v1672_v13, %s3243_s13  ;;  %v1721_v0 = vrot.slane %v1704_v17, 4  ;;  %v1686_v13 = vperm.slane %v1678_v41, %v3287_v8  ;;  %v1740_v39 = vsel %vm169_vm0, 0.0, %v1739_v54 }
 0x33e   :  { %v2977_v42 = vsel %vm5432_vm11, %v2976_v5, %v2319_v57  ;;  %vm5433_vm11 = vcmask 1043456   ;;  %v5671_v57 = vld [vmem:[#allocation108_spill] sm:$0xff]  ;;  %v1724_v45 = vsel %vm169_vm0, 0.0, %v1723_v27 }
 0x33f   :  { %v2978_v55 = vsel %vm2883_vm13, %v2977_v42, %v5668_v10  ;;  %v1722_v56 = vsel %vm169_vm0, 0.0, %v1721_v0  ;;  %v5673_v42 = vld [vmem:[#allocation110_spill] sm:$0xff]  ;;  %v1710_v34 = vsel %vm169_vm0, %v1709_v25, %v1686_v13  ;;  %v5681_v25 = vld [vmem:[#allocation115_spill] sm:$0xff] }
 0x340   :  { %v2979_v2 = vsel %vm2885_vm14, %v2978_v55, %v5669_v52  ;;  %v1305_v30 = vrot.slane %v5673_v42, 4  ;;  %v5052_v52 = vperm.slane %v1710_v34, %v3291_v15 }
 0x341   :  { %v3114_v35 = vrot.slane %v2979_v2, 2  ;;  %v5675_v2 = vld [vmem:[#allocation47_spill] sm:$0xff] }
 0x342   :  { %2718 = vrot.lane.b32.xlu1 %v1674_v49, %s3246_s16  ;;  %v1306_v55 = vsel %vm169_vm0, 0.0, %v1305_v30  ;;  %v1734_v43 = vperm.slane %v5675_v2, %v3287_v8  ;;  %v1729_v20 = vrot.slane %v5675_v2, 4 }
 0x343   :  { %2462 = vrot.lane.b32.xlu2 %v1256_v38, %s3243_s13  ;;  %v3121_v9 = vsel %vm5434_vm15, %v3113_v22, %v3114_v35  ;;  %vm5677_vm15 = vcmask 228352   ;;  %s5690_s13 = smov 80  }
 0x344   :  { %v3123_v24 = vsel %vm5433_vm11, %v3119_v37, %v3121_v9  ;;  %vm5676_vm11 = vcmask 195584   ;;  %v1748_v37 = vperm.slane %v1740_v39, %v3287_v8 }
 0x345   :  { %v2331_v47 = vpop.permute.xlu2 %2330  ;;  %2722 = vrot.lane.b32.xlu0 %v5011_v60, %s3245_s15  ;;  %3129 = vst [vmem:[#allocation5] sm:$0xff] %v3123_v24  ;;  %v1730_v24 = vsel %vm169_vm0, 0.0, %v1729_v20 }
 0x346   :  { %v2980_v31 = vsel %vm5436_vm1, %v4546_v6, %v2331_v47  ;;  %v1711_v6 = vrot.slane %v1686_v13, 4  ;;  %v1751_v47 = vrot.slane %v1734_v43, 4  ;;  %v1761_v29 = vrot.slane %v1748_v37, 4 }
 0x347   :  { %v2981_v53 = vsel %vm5435_vm2, %v2980_v31, %v4410_v11  ;;  %v1744_v11 = vperm.slane %v5672_v19, %v3287_v8  ;;  %v5682_v19 = vld [vmem:[#allocation122_spill] sm:$0xff]  ;;  %vm5685_vm2 = vcmask 424960   ;;  %vm5714_vm1 = vcmask 883712  }
 0x348   :  { %v2982_v23 = vsel %vm2829_vm3, %v2981_v53, %v4420_v46  ;;  %v1712_v4 = vsel %vm169_vm0, %v1696_v44, %v1711_v6  ;;  %v5680_v44 = vld [vmem:[#allocation120_spill] sm:$0xff]  ;;  %v1738_v53 = vperm.slane %v1730_v24, %v3287_v8  ;;  %v5692_v24 = vld [vmem:[#allocation125_spill] sm:$0xff] }
 0x349   :  { %v1749_v46 = vrot.slane %v1744_v11, 4  ;;  %v1720_v22 = vperm.slane %v1712_v4, %v3291_v15  ;;  %v1752_v6 = vsel %vm169_vm0, %v1744_v11, %v1751_v47 }
 0x34a   :  { %2730 = vrot.lane.b32.xlu1 %v1704_v17, %s3248_s18  ;;  %v5678_v17 = vld [vmem:[#allocation119_spill] sm:$0xff]  ;;  %v1763_v27 = vrot.slane %v1738_v53, 4  ;;  %v5092_v30 = vperm.slane %v1752_v6, %v3291_v15 }
 0x34b   :  { %2474 = vrot.lane.b32.xlu2 %v5671_v57, %s3245_s15  ;;  %v1750_v59 = vsel %vm169_vm0, %v1749_v46, %v1734_v43  ;;  %v1727_v38 = vrot.slane %v1720_v22, 4  ;;  %v5686_v46 = vld [vmem:[#allocation45_spill] sm:$0xff]  ;;  %v5687_v43 = vld [vmem:[#allocation52_spill] sm:$0xff]  ;;  %v5695_v6 = vld [vmem:[#allocation127_spill] sm:$0xff] }
 0x34c   :  { %v5067_v9 = vperm.slane %v1750_v59, %v3291_v15  ;;  %v1764_v54 = vsel %vm169_vm0, %v1748_v37, %v1763_v27  ;;  %v1781_v37 = vrot.slane %v5687_v43, 4 }
 0x34d   :  { %v2343_v5 = vpop.permute.xlu2 %2342  ;;  %2734 = vrot.lane.b32.xlu0 %v1722_v56, %s3250_s20  ;;  %v1728_v41 = vsel %vm169_vm0, 0.0, %v1727_v38  ;;  %v1311_v56 = vrot.slane %v5681_v25, 4 }
 0x34e   :  { %v2983_v26 = vsel %vm2831_vm4, %v2982_v23, %v2343_v5  ;;  %v1773_v13 = vrot.slane %v5067_v9, 4  ;;  %v1762_v23 = vsel %vm169_vm0, %v1761_v29, %v1738_v53 }
 0x34f   :  { %v2984_v10 = vsel %vm2833_vm5, %v2983_v26, %v5674_v3  ;;  %v1312_v42 = vsel %vm169_vm0, 0.0, %v1311_v56  ;;  %v1768_v34 = vperm.slane %v1762_v23, %v3291_v15  ;;  %v1791_v3 = vrot.slane %v5686_v46, 4 }
 0x350   :  { %v2985_v49 = vsel %vm5676_vm11, %v2984_v10, %v4440_v33  ;;  %v1774_v5 = vsel %vm169_vm0, 0.0, %v1773_v13  ;;  %vm5683_vm11 = vcmask 359424   ;;  %v5102_v10 = vpop.permute.xlu1 %2466  ;;  %v1782_v13 = vsel %vm169_vm0, 0.0, %v1781_v37 }
 0x351   :  { %v1777_v2 = vrot.slane %v1768_v34, 4  ;;  %v1792_v59 = vsel %vm169_vm0, 0.0, %v1791_v3 }
 0x352   :  { %2742 = vrot.lane.b32.xlu1 %v1724_v45, %s3251_s21 }
 0x353   :  { %2486 = vrot.lane.b32.xlu2 %v1306_v55, %s3250_s20  ;;  %v1796_v55 = vperm.slane %v5686_v46, %v3287_v8  ;;  %v1778_v38 = vsel %vm169_vm0, 0.0, %v1777_v2 }
 0x355   :  { %v2355_v35 = vpop.permute.xlu2 %2354  ;;  %2746 = vrot.lane.b32.xlu0 %v5052_v52, %s3252_s22  ;;  %v1801_v20 = vrot.slane %v1796_v55, 4 }
 0x356   :  { %v2986_v63 = vsel %vm5677_vm15, %v2985_v49, %v2355_v35  ;;  %vm5684_vm15 = vcmask 392192   ;;  %v5111_v35 = vpop.permute.xlu0 %2470  ;;  %v5688_v49 = vld [vmem:[#allocation124_spill] sm:$0xff] }
 0x357   :  { %v2987_v33 = vsel %vm2839_vm8, %v2986_v63, %v5678_v17  ;;  %v5691_v63 = vld [vmem:[#allocation116_spill] sm:$0xff] }
 0x358   :  { %v2988_v0 = vsel %vm2841_vm9, %v2987_v33, %v5680_v44  ;;  %v5130_v53 = vpop.permute.xlu1 %2478 }
 0x35a   :  { %2754 = vrot.lane.b32.xlu1 %v1720_v22, %s3254_s24  ;;  %v1786_v22 = vperm.slane %v5687_v43, %v3287_v8  ;;  %v5702_v43 = vld [vmem:[#allocation121_spill] sm:$0xff] }
 0x35b   :  { %2498 = vrot.lane.b32.xlu2 %v5679_v62, %s3252_s22 }
 0x35c   :  { %v1803_v17 = vrot.slane %v1786_v22, 4 }
 0x35d   :  { %v2367_v31 = vpop.permute.xlu2 %2366  ;;  %2758 = vrot.lane.b32.xlu0 %v1728_v41, %s3255_s25  ;;  %v1800_v41 = vperm.slane %v1792_v59, %v3287_v8  ;;  %v5703_v59 = vld [vmem:[#allocation25_spill] sm:$0xff] }
 0x35e   :  { %v2989_v57 = vsel %vm2843_vm10, %v2988_v0, %v2367_v31  ;;  %v5694_v31 = vld [vmem:[#allocation118_spill] sm:$0xff]  ;;  %v1802_v0 = vsel %vm169_vm0, %v1801_v20, %v1786_v22  ;;  %v1804_v25 = vsel %vm169_vm0, %v1796_v55, %v1803_v17  ;;  %v5706_v17 = vld [vmem:[#allocation123_spill] sm:$0xff] }
 0x35f   :  { %v2990_v26 = vsel %vm5683_vm11, %v2989_v57, %v5682_v19  ;;  %vm5693_vm11 = vcmask 490496   ;;  %v1361_v44 = vrot.slane %v5694_v31, 4  ;;  %v1813_v56 = vrot.slane %v1800_v41, 4 }
 0x360   :  { %v2991_v45 = vsel %vm5684_vm15, %v2990_v26, %v4483_v18  ;;  %v5109_v18 = vperm.slane %v1764_v54, %v3291_v15  ;;  %vm5696_vm15 = vcmask 556032   ;;  %v5140_v27 = vperm.slane %v1802_v0, %v3291_v15  ;;  %v5143_v26 = vpop.permute.xlu0 %2482  ;;  %v2491_v2 = vpop.permute.xlu1 %2490 }
 0x361   :  { %v1362_v23 = vsel %vm169_vm0, 0.0, %v1361_v44  ;;  %v1790_v19 = vperm.slane %v1782_v13, %v3287_v8  ;;  %v5700_v8 = vld [vmem:[#allocation131_spill] sm:$0xff] }
 0x362   :  { %2766 = vrot.lane.b32.xlu1 %v1774_v5, %s3257_s27  ;;  %v1779_v47 = vrot.slane %v5109_v18, 4 }
 0x363   :  { %2510 = vrot.lane.b32.xlu2 %v1312_v42, %s3255_s25  ;;  %v1812_v42 = vperm.slane %v1804_v25, %v3291_v15  ;;  %v1814_v54 = vsel %vm169_vm0, %v1813_v56, %v1790_v19  ;;  %v1815_v22 = vrot.slane %v1790_v19, 4 }
 0x364   :  { %v1780_v57 = vsel %vm169_vm0, 0.0, %v1779_v47  ;;  %v5153_v3 = vperm.slane %v1814_v54, %v3291_v15  ;;  %v5707_v47 = vld [vmem:[#allocation31_spill] sm:$0xff]  ;;  %v5717_v54 = vld [vmem:[#allocation130_spill] sm:$0xff] }
 0x365   :  { %v2379_v11 = vpop.permute.xlu2 %2378  ;;  %2770 = vrot.lane.b32.xlu0 %v5092_v30, %s3265_s6  ;;  %v1827_v46 = vrot.slane %v1812_v42, 4 }
 0x366   :  { %v2992_v4 = vsel %vm5685_vm2, %v2991_v45, %v2379_v11  ;;  %vm5689_vm2 = vcmask 457728   ;;  %v5697_v11 = vld [vmem:[#allocation129_spill] sm:$0xff]  ;;  %v1829_v20 = vrot.slane %v5153_v3, 4 }
 0x367   :  { %v2993_v39 = vsel %vm5689_vm2, %v2992_v4, %v5688_v49  ;;  %vm5698_vm2 = vcmask 588800   ;;  %v1828_v49 = vsel %vm169_vm0, 0.0, %v1827_v46 }
 0x368   :  { %v2994_v62 = vsel %vm5693_vm11, %v2993_v39, %v5692_v24  ;;  %vm5699_vm11 = vcmask 621568   ;;  %v1816_v24 = vsel %vm169_vm0, %v1800_v41, %v1815_v22  ;;  %v2503_v0 = vpop.permute.xlu1 %2502 }
 0x369   :  { %v5175_v44 = vperm.slane %v1816_v24, %v3291_v15 }
 0x36a   :  { %2778 = vrot.lane.b32.xlu1 %v1768_v34, %s5690_s13 }
 0x36b   :  { %2522 = vrot.lane.b32.xlu2 %v5691_v63, %s3265_s6 }
 0x36d   :  { %v2391_v33 = vpop.permute.xlu2 %2390  ;;  %2782 = vrot.lane.b32.xlu0 %v1778_v38, %s3259_s29  ;;  %v2495_v38 = vpop.permute.xlu0 %2494 }
 0x36e   :  { %v2995_v29 = vsel %vm5438_vm7, %v2994_v62, %v2391_v33  ;;  %v1411_v33 = vrot.slane %v5706_v17, 4  ;;  %v1830_v62 = vsel %vm169_vm0, 0.0, %v1829_v20 }
 0x36f   :  { %v2996_v5 = vsel %vm5696_vm15, %v2995_v29, %v5695_v6  ;;  %vm5701_vm15 = vcmask 654336   ;;  %v5711_v6 = vld [vmem:[#allocation135_spill] sm:$0xff] }
 0x370   :  { %v2997_v45 = vsel %vm5698_vm2, %v2996_v5, %v5697_v11  ;;  %vm5704_vm2 = vcmask 687104   ;;  %v1412_v31 = vsel %vm169_vm0, 0.0, %v1411_v33  ;;  %v2515_v11 = vpop.permute.xlu1 %2514 }
 0x372   :  { %2790 = vrot.lane.b32.xlu1 %v1780_v57, %s3261_s2  ;;  %v5708_v57 = vld [vmem:[#allocation133_spill] sm:$0xff] }
 0x373   :  { %2534 = vrot.lane.b32.xlu2 %v1362_v23, %s3259_s29  ;;  %v5713_v23 = vld [vmem:[#allocation126_spill] sm:$0xff] }
 0x375   :  { %v2403_v34 = vpop.permute.xlu2 %2402  ;;  %2794 = vrot.lane.b32.xlu0 %v5140_v27, %s3263_s4  ;;  %v2507_v56 = vpop.permute.xlu0 %2506 }
 0x376   :  { %v2998_v4 = vsel %vm5699_vm11, %v2997_v45, %v2403_v34  ;;  %vm5705_vm11 = vcmask 719872  }
 0x377   :  { %v2999_v55 = vsel %vm5701_vm15, %v2998_v4, %v5700_v8  ;;  %vm5709_vm15 = vcmask 785408  }
 0x378   :  { %v3000_v63 = vsel %vm5704_vm2, %v2999_v55, %v5703_v59  ;;  %vm5710_vm2 = vcmask 818176  }
 0x37a   :  { %2802 = vrot.lane.b32.xlu1 %v1812_v42, %s3266_s7 }
 0x37b   :  { %2546 = vrot.lane.b32.xlu2 %v5702_v43, %s3263_s4  ;;  %v5718_v43 = vld [vmem:[#allocation132_spill] sm:$0xff] }
 0x37c   :  { %v1465_v22 = vrot.slane %v5718_v43, 4 }
 0x37d   :  { %v2415_v39 = vpop.permute.xlu2 %2414  ;;  %2806 = vrot.lane.b32.xlu0 %v1828_v49, %s3267_s8  ;;  %v2519_v45 = vpop.permute.xlu0 %2518 }
 0x37e   :  { %v3001_v37 = vsel %vm5705_vm11, %v3000_v63, %v2415_v39  ;;  %vm5712_vm11 = vcmask 850944   ;;  %v1466_v49 = vsel %vm169_vm0, 0.0, %v1465_v22 }
 0x37f   :  { %v3002_v29 = vsel %vm2869_vm6, %v3001_v37, %v5707_v47 }
 0x380   :  { %v3003_v25 = vsel %vm5709_vm15, %v3002_v29, %v5708_v57  ;;  %vm5716_vm15 = vcmask 949248  }
 0x382   :  { %2814 = vrot.lane.b32.xlu1 %v1830_v62, %s3269_s10  ;;  %v1515_v62 = vrot.slane %v4617_v14, 4 }
 0x383   :  { %2558 = vrot.lane.b32.xlu2 %v1412_v31, %s3267_s8 }
 0x385   :  { %v2427_v13 = vpop.permute.xlu2 %2426  ;;  %2818 = vrot.lane.b32.xlu0 %v5175_v44, %s5510_s5  ;;  %v2531_v39 = vpop.permute.xlu0 %2530 }
 0x386   :  { %v3004_v41 = vsel %vm5710_vm2, %v3003_v25, %v2427_v13  ;;  %vm5722_vm2 = vcmask 359424  }
 0x387   :  { %v3005_v5 = vsel %vm5712_vm11, %v3004_v41, %v5711_v6  ;;  %vm5723_vm11 = vcmask 392192   ;;  %v1565_v41 = vrot.slane %v4709_v16, 4 }
 0x388   :  { %v3006_v42 = vsel %vm5714_vm1, %v3005_v5, %v4600_v50  ;;  %v2527_v50 = vpop.permute.xlu1 %2526  ;;  %vm5720_vm1 = vcmask 195584  }
 0x38b   :  { %2570 = vrot.lane.b32.xlu2 %v5713_v23, %s5510_s5 }
 0x38d   :  { %v2439_v19 = vpop.permute.xlu2 %2438  ;;  %v2543_v33 = vpop.permute.xlu0 %2542 }
 0x38e   :  { %v3007_v34 = vsel %vm5715_vm12, %v3006_v42, %v2439_v19  ;;  %vm5721_vm12 = vcmask 228352  }
 0x38f   :  { %v3008_v4 = vsel %vm5716_vm15, %v3007_v34, %v4621_v58  ;;  %vm5724_vm15 = vcmask 424960  }
 0x390   :  { %v3009_v8 = vsel %vm2883_vm13, %v3008_v4, %v4640_v48  ;;  %v2539_v20 = vpop.permute.xlu1 %2538  ;;  %v5719_v48 = vld [vmem:[#allocation134_spill] sm:$0xff] }
 0x393   :  { %2582 = vrot.lane.b32.xlu2 %v5717_v54, %s3239_s12  ;;  %v1571_v54 = vrot.slane %v4811_v21, 4  ;;  %s3272_s12 = smov [#allocation5]  }
 0x395   :  { %v2451_v46 = vpop.permute.xlu2 %2450 }
 0x396   :  { %v5196_v55 = vsel %vm2885_vm14, %v3009_v8, %v2451_v46 }
 0x39b   :  { %2594 = vrot.lane.b32.xlu2 %v1466_v49, %s3246_s16  ;;  %s3138_s16 = sshll.u32 %s5370_s1, 4  ;;  %s3139_s16 = int_to_ptr.hbm [resolvable:$true] %s3138_s16 }
 0x39d   :  { %v2463_v59 = vpop.permute.xlu2 %2462 }
 0x39e   :  { %v3013_v58 = vsel %vm2829_vm3, %v4687_v51, %v2463_v59  ;;  %v1516_v51 = vsel %vm169_vm0, 0.0, %v1515_v62 }
 0x39f   :  { %v3014_v63 = vsel %vm2831_vm4, %v3013_v58, %v5102_v10  ;;  %v2551_v10 = vpop.permute.xlu1 %2550 }
 0x3a0   :  { %v3015_v17 = vsel %vm2833_vm5, %v3014_v63, %v5111_v35  ;;  %v2555_v35 = vpop.permute.xlu0 %2554  ;;  %v1621_v63 = vrot.slane %v4895_v12, 4 }
 0x3a3   :  { %2606 = vrot.lane.b32.xlu2 %v5719_v48, %s3248_s18 }
 0x3a5   :  { %v2475_v37 = vpop.permute.xlu2 %2474 }
 0x3a6   :  { %v3016_v24 = vsel %vm5720_vm1, %v3015_v17, %v2475_v37  ;;  %vm5725_vm1 = vcmask 457728  }
 0x3a7   :  { %v3017_v47 = vsel %vm5721_vm12, %v3016_v24, %v5130_v53  ;;  %v2563_v6 = vpop.permute.xlu1 %2562  ;;  %vm5726_vm12 = vcmask 490496  }
 0x3a8   :  { %v3018_v31 = vsel %vm2839_vm8, %v3017_v47, %v5143_v26  ;;  %v2567_v5 = vpop.permute.xlu0 %2566  ;;  %v1566_v26 = vsel %vm169_vm0, 0.0, %v1565_v41 }
 0x3ab   :  { %2618 = vrot.lane.b32.xlu2 %v1516_v51, %s3251_s21 }
 0x3ad   :  { %v2487_v29 = vpop.permute.xlu2 %2486 }
 0x3ae   :  { %v3019_v13 = vsel %vm2841_vm9, %v3018_v31, %v2487_v29 }
 0x3af   :  { %v3020_v57 = vsel %vm2843_vm10, %v3019_v13, %v2491_v2  ;;  %v2575_v42 = vpop.permute.xlu1 %2574 }
 0x3b0   :  { %v3021_v53 = vsel %vm5722_vm2, %v3020_v57, %v2495_v38  ;;  %v2579_v16 = vpop.permute.xlu0 %2578  ;;  %vm5727_vm2 = vcmask 556032  }
 0x3b3   :  { %2630 = vrot.lane.b32.xlu2 %v4649_v28, %s3254_s24 }
 0x3b5   :  { %v2499_v14 = vpop.permute.xlu2 %2498 }
 0x3b6   :  { %v3022_v25 = vsel %vm5723_vm11, %v3021_v53, %v2499_v14  ;;  %vm5728_vm11 = vcmask 588800   ;;  %v5740_v14 = vld [vmem:[#allocation128_spill] sm:$0xff] }
 0x3b7   :  { %v3023_v23 = vsel %vm5724_vm15, %v3022_v25, %v2503_v0  ;;  %vm5729_vm15 = vcmask 621568   ;;  %v2587_v8 = vpop.permute.xlu1 %2586 }
 0x3b8   :  { %v3024_v2 = vsel %vm5725_vm1, %v3023_v23, %v2507_v56  ;;  %v1572_v56 = vsel %vm169_vm0, 0.0, %v1571_v54  ;;  %vm5730_vm1 = vcmask 654336   ;;  %v2591_v22 = vpop.permute.xlu0 %2590 }
 0x3bb   :  { %2642 = vrot.lane.b32.xlu2 %v1566_v26, %s3257_s27 }
 0x3bd   :  { %v2511_v19 = vpop.permute.xlu2 %2510 }
 0x3be   :  { %v3025_v28 = vsel %vm5726_vm12, %v3024_v2, %v2511_v19  ;;  %vm5731_vm12 = vcmask 687104  }
 0x3bf   :  { %v3026_v38 = vsel %vm5438_vm7, %v3025_v28, %v2515_v11  ;;  %vm5732_vm7 = vcmask 719872   ;;  %v2599_v21 = vpop.permute.xlu1 %2598 }
 0x3c0   :  { %v3027_v4 = vsel %vm5727_vm2, %v3026_v38, %v2519_v45  ;;  %v1645_v45 = vrot.slane %v4890_v1, 4  ;;  %vm5733_vm2 = vcmask 785408   ;;  %v2603_v48 = vpop.permute.xlu0 %2602 }
 0x3c3   :  { %2654 = vrot.lane.b32.xlu2 %v4748_v32, %s5690_s13 }
 0x3c5   :  { %v2523_v34 = vpop.permute.xlu2 %2522 }
 0x3c6   :  { %v3028_v0 = vsel %vm5728_vm11, %v3027_v4, %v2523_v34  ;;  %vm5734_vm11 = vcmask 818176   ;;  %v1725_v34 = vrot.slane %v5052_v52, 4 }
 0x3c7   :  { %v3029_v46 = vsel %vm5729_vm15, %v3028_v0, %v2527_v50  ;;  %vm5736_vm15 = vcmask 883712   ;;  %v2611_v24 = vpop.permute.xlu1 %2610 }
 0x3c8   :  { %v3030_v11 = vsel %vm5730_vm1, %v3029_v46, %v2531_v39  ;;  %v1646_v39 = vsel %vm169_vm0, %v1645_v45, %v4871_v7  ;;  %v2615_v62 = vpop.permute.xlu0 %2614  ;;  %vm5737_vm1 = vcmask 916480   ;;  %v1726_v54 = vsel %vm169_vm0, 0.0, %v1725_v34 }
 0x3c9   :  { %v5252_v1 = vperm.slane %v1646_v39, %v3291_v15 }
 0x3cb   :  { %2666 = vrot.lane.b32.xlu2 %v1572_v56, %s3261_s2  ;;  %v1669_v12 = vrot.slane %v5252_v1, 4 }
 0x3cd   :  { %v2535_v43 = vpop.permute.xlu2 %2534  ;;  %v1670_v47 = vsel %vm169_vm0, 0.0, %v1669_v12 }
 0x3ce   :  { %v3031_v32 = vsel %vm5731_vm12, %v3030_v11, %v2535_v43  ;;  %vm5738_vm12 = vcmask 949248  }
 0x3cf   :  { %v3032_v49 = vsel %vm5732_vm7, %v3031_v32, %v2539_v20  ;;  %v1622_v20 = vsel %vm169_vm0, 0.0, %v1621_v63  ;;  %vm5735_vm7 = vcmask 850944   ;;  %v2623_v13 = vpop.permute.xlu1 %2622 }
 0x3d0   :  { %v3033_v59 = vsel %vm2869_vm6, %v3032_v49, %v2543_v33  ;;  %v2627_v57 = vpop.permute.xlu0 %2626  ;;  %v1775_v49 = vrot.slane %v5092_v30, 4 }
 0x3d3   :  { %2678 = vrot.lane.b32.xlu2 %v4840_v61, %s3266_s7 }
 0x3d5   :  { %v2547_v50 = vpop.permute.xlu2 %2546 }
 0x3d6   :  { %v3034_v58 = vsel %vm5733_vm2, %v3033_v59, %v2547_v50  ;;  %vm5739_vm2 = vcmask 1041408   ;;  %v1776_v50 = vsel %vm169_vm0, 0.0, %v1775_v49 }
 0x3d7   :  { %v3035_v37 = vsel %vm5734_vm11, %v3034_v58, %v2551_v10  ;;  %vm5741_vm11 = vcmask 31744   ;;  %v2635_v26 = vpop.permute.xlu1 %2634 }
 0x3d8   :  { %v3036_v17 = vsel %vm5735_vm7, %v3035_v37, %v2555_v35  ;;  %v3042_v53 = vsel %vm5741_vm11, %v5740_v14, %v2579_v16  ;;  %vm5742_vm7 = vcmask 64512   ;;  %vm5747_vm11 = vcmask 424960  }
 0x3db   :  { %2690 = vrot.lane.b32.xlu2 %v1622_v20, %s3269_s10 }
 0x3dd   :  { %v2559_v61 = vpop.permute.xlu2 %2558 }
 0x3de   :  { %v3037_v33 = vsel %vm5736_vm15, %v3036_v17, %v2559_v61  ;;  %vm5743_vm15 = vcmask 195584   ;;  %v1825_v17 = vrot.slane %v5140_v27, 4 }
 0x3df   :  { %v3038_v7 = vsel %vm5737_vm1, %v3037_v33, %v2563_v6  ;;  %v1675_v6 = vrot.slane %v5011_v60, 4  ;;  %vm5744_vm1 = vcmask 228352  }
 0x3e0   :  { %v3039_v15 = vsel %vm5738_vm12, %v3038_v7, %v2567_v5  ;;  %vm5745_vm12 = vcmask 359424   ;;  %v1826_v12 = vsel %vm169_vm0, 0.0, %v1825_v17 }
 0x3e1   :  { %v1676_v23 = vsel %vm169_vm0, 0.0, %v1675_v6 }
 0x3e3   :  { %2702 = vrot.lane.b32.xlu2 %v1670_v47, %s3242_s0  ;;  %s3136_s0 = sshll.u32 %s3272_s12, 4  ;;  %s3137_s0 = int_to_ptr.vmem [resolvable:$true] %s3136_s0 }
 0x3e5   :  { %v2571_v51 = vpop.permute.xlu2 %2570 }
 0x3e6   :  { %v3040_v10 = vsel %vm2883_vm13, %v3039_v15, %v2571_v51 }
 0x3e7   :  { %v3041_v29 = vsel %vm2885_vm14, %v3040_v10, %v2575_v42  ;;  %v2647_v42 = vpop.permute.xlu1 %2646 }
 0x3e8   :  { %v3115_v31 = vrot.slane %v3041_v29, 6  ;;  %v1831_v29 = vrot.slane %v5175_v44, 4 }
 0x3ea   :  { %v5266_v35 = vsel %vm5739_vm2, %v5196_v55, %v3115_v31  ;;  %vm5746_vm2 = vcmask 392192   ;;  %v1832_v14 = vsel %vm169_vm0, 0.0, %v1831_v29  ;;  %vm5765_vm0 = vcmask 195584  }
 0x3eb   :  { %2714 = vrot.lane.b32.xlu2 %v4964_v36, %s3244_s14  ;;  %v2639_v36 = vpop.permute.xlu0 %2638 }
 0x3ed   :  { %v2583_v25 = vpop.permute.xlu2 %2582 }
 0x3ee   :  { %v3043_v41 = vsel %vm5742_vm7, %v3042_v53, %v2583_v25  ;;  %vm5748_vm7 = vcmask 457728  }
 0x3ef   :  { %v3044_v5 = vsel %vm2829_vm3, %v3043_v41, %v2587_v8  ;;  %v2659_v8 = vpop.permute.xlu1 %2658 }
 0x3f0   :  { %v3045_v19 = vsel %vm2831_vm4, %v3044_v5, %v2591_v22 }
 0x3f3   :  { %2726 = vrot.lane.b32.xlu2 %v1676_v23, %s3247_s17  ;;  %v2651_v4 = vpop.permute.xlu0 %2650 }
 0x3f5   :  { %v2595_v55 = vpop.permute.xlu2 %2594 }
 0x3f6   :  { %v3046_v2 = vsel %vm2833_vm5, %v3045_v19, %v2595_v55 }
 0x3f7   :  { %v3047_v28 = vsel %vm5743_vm15, %v3046_v2, %v2599_v21  ;;  %v2671_v45 = vpop.permute.xlu1 %2670  ;;  %vm5749_vm15 = vcmask 490496  }
 0x3f8   :  { %v3048_v38 = vsel %vm5744_vm1, %v3047_v28, %v2603_v48  ;;  %vm5750_vm1 = vcmask 523264  }
 0x3fb   :  { %2738 = vrot.lane.b32.xlu2 %v5026_v40, %s3249_s19  ;;  %v2663_v43 = vpop.permute.xlu0 %2662 }
 0x3fd   :  { %v2607_v60 = vpop.permute.xlu2 %2606 }
 0x3fe   :  { %v3049_v16 = vsel %vm2839_vm8, %v3048_v38, %v2607_v60 }
 0x3ff   :  { %v3050_v0 = vsel %vm2841_vm9, %v3049_v16, %v2611_v24  ;;  %v2683_v48 = vpop.permute.xlu1 %2682 }
 0x400   :  { %v3051_v56 = vsel %vm2843_vm10, %v3050_v0, %v2615_v62 }
 0x403   :  { %2750 = vrot.lane.b32.xlu2 %v1726_v54, %s3253_s23  ;;  %v2675_v59 = vpop.permute.xlu0 %2674 }
 0x405   :  { %v2619_v46 = vpop.permute.xlu2 %2618 }
 0x406   :  { %v3052_v40 = vsel %vm5745_vm12, %v3051_v56, %v2619_v46  ;;  %vm5751_vm12 = vcmask 556032  }
 0x407   :  { %v3053_v11 = vsel %vm5746_vm2, %v3052_v40, %v2623_v13  ;;  %vm5752_vm2 = vcmask 588800   ;;  %v5310_v24 = vpop.permute.xlu1 %2694 }
 0x408   :  { %v3054_v22 = vsel %vm5747_vm11, %v3053_v11, %v2627_v57  ;;  %vm5753_vm11 = vcmask 621568  }
 0x40b   :  { %2762 = vrot.lane.b32.xlu2 %v5067_v9, %s3256_s26  ;;  %v2687_v20 = vpop.permute.xlu0 %2686 }
 0x40d   :  { %v2631_v52 = vpop.permute.xlu2 %2630 }
 0x40e   :  { %v3055_v32 = vsel %vm5748_vm7, %v3054_v22, %v2631_v52  ;;  %vm5754_vm7 = vcmask 654336  }
 0x40f   :  { %v3056_v21 = vsel %vm5749_vm15, %v3055_v32, %v2635_v26  ;;  %vm5755_vm15 = vcmask 687104   ;;  %v2707_v31 = vpop.permute.xlu1 %2706 }
 0x410   :  { %v3057_v63 = vsel %vm5750_vm1, %v3056_v21, %v2639_v36  ;;  %vm5756_vm1 = vcmask 719872  }
 0x413   :  { %2774 = vrot.lane.b32.xlu2 %v1776_v50, %s3262_s3  ;;  %v5314_v47 = vpop.permute.xlu0 %2698 }
 0x415   :  { %v2643_v58 = vpop.permute.xlu2 %2642 }
 0x416   :  { %v3058_v9 = vsel %vm5751_vm12, %v3057_v63, %v2643_v58  ;;  %vm5757_vm12 = vcmask 785408  }
 0x417   :  { %v3059_v39 = vsel %vm5752_vm2, %v3058_v9, %v2647_v42  ;;  %vm5758_vm2 = vcmask 818176   ;;  %v2719_v41 = vpop.permute.xlu1 %2718 }
 0x418   :  { %v3060_v37 = vsel %vm5753_vm11, %v3059_v39, %v2651_v4  ;;  %vm5759_vm11 = vcmask 850944  }
 0x41b   :  { %2786 = vrot.lane.b32.xlu2 %v5109_v18, %s3260_s30  ;;  %v2711_v13 = vpop.permute.xlu0 %2710 }
 0x41d   :  { %v2655_v30 = vpop.permute.xlu2 %2654 }
 0x41e   :  { %v3061_v61 = vsel %vm5754_vm7, %v3060_v37, %v2655_v30  ;;  %vm5760_vm7 = vcmask 883712  }
 0x41f   :  { %v3062_v33 = vsel %vm5755_vm15, %v3061_v61, %v2659_v8  ;;  %vm5761_vm15 = vcmask 916480   ;;  %v2731_v23 = vpop.permute.xlu1 %2730 }
 0x420   :  { %v3063_v7 = vsel %vm5756_vm1, %v3062_v33, %v2663_v43  ;;  %vm5762_vm1 = vcmask 949248  }
 0x423   :  { %2798 = vrot.lane.b32.xlu2 %v1826_v12, %s5555_s28  ;;  %v2723_v6 = vpop.permute.xlu0 %2722 }
 0x425   :  { %v2667_v62 = vpop.permute.xlu2 %2666 }
 0x426   :  { %v3064_v18 = vsel %vm2869_vm6, %v3063_v7, %v2667_v62 }
 0x427   :  { %v3065_v51 = vsel %vm5757_vm12, %v3064_v18, %v2671_v45  ;;  %vm5763_vm12 = vcmask 31744   ;;  %v2743_v36 = vpop.permute.xlu1 %2742 }
 0x428   :  { %v3066_v15 = vsel %vm5758_vm2, %v3065_v51, %v2675_v59  ;;  %vm5764_vm2 = vcmask 64512  }
 0x42b   :  { %2810 = vrot.lane.b32.xlu2 %v5153_v3, %s3268_s9  ;;  %v2735_v55 = vpop.permute.xlu0 %2734 }
 0x42d   :  { %v2679_v27 = vpop.permute.xlu2 %2678 }
 0x42e   :  { %v3067_v10 = vsel %vm5759_vm11, %v3066_v15, %v2679_v27  ;;  %vm5766_vm11 = vcmask 228352  }
 0x42f   :  { %v3068_v57 = vsel %vm5760_vm7, %v3067_v10, %v2683_v48  ;;  %v2755_v0 = vpop.permute.xlu1 %2754  ;;  %vm5770_vm7 = vcmask 457728  }
 0x430   :  { %v3069_v25 = vsel %vm5761_vm15, %v3068_v57, %v2687_v20  ;;  %vm5771_vm15 = vcmask 490496  }
 0x433   :  { %2822 = vrot.lane.b32.xlu2 %v1832_v14, %s3271_s11  ;;  %v2747_v60 = vpop.permute.xlu0 %2746 }
 0x435   :  { %v2691_v53 = vpop.permute.xlu2 %2690 }
 0x436   :  { %v3070_v3 = vsel %vm5762_vm1, %v3069_v25, %v2691_v53  ;;  %vm5775_vm1 = vcmask 621568  }
 0x437   :  { %v2767_v43 = vpop.permute.xlu1 %2766 }
 0x43d   :  { %v2703_v5 = vpop.permute.xlu2 %2702 }
 0x43e   :  { %v3073_v44 = vsel %vm5763_vm12, %v5252_v1, %v2703_v5  ;;  %v2759_v1 = vpop.permute.xlu0 %2758  ;;  %vm5776_vm12 = vcmask 654336  }
 0x43f   :  { %v3074_v19 = vsel %vm5764_vm2, %v3073_v44, %v2707_v31  ;;  %v2779_v21 = vpop.permute.xlu1 %2778  ;;  %vm5777_vm2 = vcmask 687104  }
 0x440   :  { %v3075_v28 = vsel %vm2829_vm3, %v3074_v19, %v2711_v13  ;;  %vm5767_vm3 = vcmask 359424   ;;  %v3071_v13 = vsel %vm2883_vm13, %v3070_v3, %v5310_v24 }
 0x441   :  { %v3072_v53 = vsel %vm2885_vm14, %v3071_v13, %v5314_v47 }
 0x442   :  { %v3116_v5 = vrot.slane %v3072_v53, 4 }
 0x445   :  { %v2715_v26 = vpop.permute.xlu2 %2714 }
 0x446   :  { %v3076_v42 = vsel %vm2831_vm4, %v3075_v28, %v2715_v26  ;;  %vm5768_vm4 = vcmask 392192   ;;  %v2771_v52 = vpop.permute.xlu0 %2770 }
 0x447   :  { %v3077_v38 = vsel %vm2833_vm5, %v3076_v42, %v2719_v41  ;;  %vm5769_vm5 = vcmask 424960   ;;  %v2791_v48 = vpop.permute.xlu1 %2790 }
 0x448   :  { %v3078_v16 = vsel %vm5765_vm0, %v3077_v38, %v2723_v6  ;;  %vm5778_vm0 = vcmask 719872  }
 0x44d   :  { %v2727_v2 = vpop.permute.xlu2 %2726 }
 0x44e   :  { %v3079_v4 = vsel %vm5766_vm11, %v3078_v16, %v2727_v2  ;;  %v2783_v58 = vpop.permute.xlu0 %2782  ;;  %vm5779_vm11 = vcmask 785408  }
 0x44f   :  { %v3080_v54 = vsel %vm2839_vm8, %v3079_v4, %v2731_v23  ;;  %vm5772_vm8 = vcmask 523264   ;;  %v2803_v62 = vpop.permute.xlu1 %2802 }
 0x450   :  { %v3081_v46 = vsel %vm2841_vm9, %v3080_v54, %v2735_v55  ;;  %vm5773_vm9 = vcmask 556032  }
 0x455   :  { %v2739_v34 = vpop.permute.xlu2 %2738 }
 0x456   :  { %v3082_v56 = vsel %vm2843_vm10, %v3081_v46, %v2739_v34  ;;  %vm5774_vm10 = vcmask 588800   ;;  %v2795_v20 = vpop.permute.xlu0 %2794 }
 0x457   :  { %v3083_v8 = vsel %vm5767_vm3, %v3082_v56, %v2743_v36  ;;  %vm5780_vm3 = vcmask 818176   ;;  %v2815_v31 = vpop.permute.xlu1 %2814 }
 0x458   :  { %v3084_v11 = vsel %vm5768_vm4, %v3083_v8, %v2747_v60  ;;  %vm5781_vm4 = vcmask 850944  }
 0x45d   :  { %v2751_v40 = vpop.permute.xlu2 %2750 }
 0x45e   :  { %v3085_v22 = vsel %vm5769_vm5, %v3084_v11, %v2751_v40  ;;  %v2807_v51 = vpop.permute.xlu0 %2806  ;;  %vm5782_vm5 = vcmask 883712  }
 0x45f   :  { %v3086_v49 = vsel %vm5770_vm7, %v3085_v22, %v2755_v0  ;;  %vm5783_vm7 = vcmask 916480  }
 0x460   :  { %v3087_v45 = vsel %vm5771_vm15, %v3086_v49, %v2759_v1  ;;  %vm5784_vm15 = vcmask 949248  }
 0x465   :  { %v2763_v32 = vpop.permute.xlu2 %2762 }
 0x466   :  { %v3088_v50 = vsel %vm5772_vm8, %v3087_v45, %v2763_v32  ;;  %v2819_v14 = vpop.permute.xlu0 %2818  ;;  %vm5786_vm8 = vcmask 1043456  }
 0x467   :  { %v3089_v63 = vsel %vm5773_vm9, %v3088_v50, %v2767_v43 }
 0x468   :  { %v3090_v9 = vsel %vm5774_vm10, %v3089_v63, %v2771_v52 }
 0x46d   :  { %v2775_v59 = vpop.permute.xlu2 %2774 }
 0x46e   :  { %v3091_v39 = vsel %vm5775_vm1, %v3090_v9, %v2775_v59 }
 0x46f   :  { %v3092_v30 = vsel %vm5776_vm12, %v3091_v39, %v2779_v21 }
 0x470   :  { %v3093_v61 = vsel %vm5777_vm2, %v3092_v30, %v2783_v58 }
 0x475   :  { %v2787_v37 = vpop.permute.xlu2 %2786 }
 0x476   :  { %v3094_v17 = vsel %vm5778_vm0, %v3093_v61, %v2787_v37 }
 0x477   :  { %v3095_v33 = vsel %vm2869_vm6, %v3094_v17, %v2791_v48  ;;  %vm5785_vm6 = vcmask 1045508  }
 0x478   :  { %v3096_v7 = vsel %vm5779_vm11, %v3095_v33, %v2795_v20 }
 0x47d   :  { %v2799_v12 = vpop.permute.xlu2 %2798 }
 0x47e   :  { %v3097_v18 = vsel %vm5780_vm3, %v3096_v7, %v2799_v12 }
 0x47f   :  { %v3098_v27 = vsel %vm5781_vm4, %v3097_v18, %v2803_v62 }
 0x480   :  { %v3099_v10 = vsel %vm5782_vm5, %v3098_v27, %v2807_v51 }
 0x485   :  { %v2811_v15 = vpop.permute.xlu2 %2810 }
 0x486   :  { %v3100_v29 = vsel %vm5783_vm7, %v3099_v10, %v2811_v15 }
 0x487   :  { %v3101_v57 = vsel %vm5784_vm15, %v3100_v29, %v2815_v31 }
 0x488   :  { %v3102_v41 = vsel %vm2883_vm13, %v3101_v57, %v2819_v14 }
 0x48d   :  { %v2823_v25 = vpop.permute.xlu2 %2822 }
 0x48e   :  { %v3103_v6 = vsel %vm2885_vm14, %v3102_v41, %v2823_v25 }
 0x48f   :  { %v3117_v23 = vrot.slane %v3103_v6, 2 }
 0x491   :  { %v3125_v24 = vsel %vm5785_vm6, %v3116_v5, %v3117_v23 }
 0x492   :  { %v3126_v47 = vsel %vm5786_vm8, %v5266_v35, %v3125_v24 }
 0x493   :  { %3130 = vst [vmem:[#allocation5 + $0x8] sm:$0xff] %v3126_v47 }
 0x494   :  { %3141 = dma.vmem_to_hbm [thread:$0]  %s3137_s0, 256, %s3139_s16, [#allocation4]  }
 0x495   :  { %3235 = dma.done.wait [#allocation4], 256  }
 0x496   :  { %3236 = vsyncadd [#allocation4], 4294967040 }
 0x497   :  { %3146 = vsyncpa [#allocation3], 1 }
 0x498   :  { %3147 = vsyncpa [#allocation4], 1 }

</bundles_post_ra>
